<compile_context>
chip_gen: v7x
topology: tpu7x:2x2x1
jax: 0.10.0
libtpu: 0.0.40
codegen_flags: <defaults>
</compile_context>

<pallas_src>
import functools
import math

import jax
import jax.numpy as jnp
from jax.experimental import pallas as pl
from jax.experimental.pallas import tpu as pltpu


# ------------------------------ fused MHA kernel ------------------------------

def _mha_head_kernel(q_ref, k_ref, v_ref, bias_ref,
                     w0_ref, b0_ref, w1_ref, b1_ref, w2_ref, b2_ref,
                     *rest, compute_dtype, return_attn, approx_recip):
    """One grid step = one (batch, head, q-tile).

    Refs:
      q_ref    : (1, tq, d_model)   raw query tile (compute_dtype)
      k_ref    : (1, Tk, d_model)   raw key rows for this batch (3rd forward arg)
      v_ref    : (1, Tk, d_model)   raw value rows for this batch (2nd forward arg)
      bias_ref : (1, 1|tq, Tk)      additive mask bias (0 / -1e9), f32
      w*_ref   : (1, d_model, d_k)  this head's slice of a projection weight
      b*_ref   : (1, 1, d_k)        this head's bias slice (f32)
      out_ref  : (1, tq, d_k) or (1, 1, tq, d_k)
      attn_ref : (1, 1, tq, Tk)     only when return_attn
      k_scr/v_scr : (Tk, d_k)       projected K/V for this (batch, head)
    """
    if return_attn:
        out_ref, attn_ref, k_scr, v_scr = rest
    else:
        out_ref, k_scr, v_scr = rest
        attn_ref = None

    qt = pl.program_id(2)

    # Project this head's K/V once per (batch, head); reuse across all q tiles.
    @pl.when(qt == 0)
    def _():
        kp = jnp.dot(k_ref[0], w1_ref[0],
                     preferred_element_type=jnp.float32) + b1_ref[0]
        vp = jnp.dot(v_ref[0], w2_ref[0],
                     preferred_element_type=jnp.float32) + b2_ref[0]
        k_scr[...] = kp.astype(compute_dtype)
        v_scr[...] = vp.astype(compute_dtype)

    # Per-tile Q head projection (1/sqrt(d_k) was folded into w0/b0 host-side,
    # so scores need no further scaling).
    qp = jnp.dot(q_ref[0], w0_ref[0],
                 preferred_element_type=jnp.float32) + b0_ref[0]
    q_h = qp.astype(compute_dtype)

    # scores = Q K^T (contract last dims; no materialized transpose), f32 acc,
    # then one broadcast add of the additive mask bias.
    scores = jax.lax.dot_general(q_h, k_scr[...], (((1,), (1,)), ((), ())),
                                 preferred_element_type=jnp.float32)
    scores = scores + bias_ref[0]

    # softmax in f32 (keeps VPU/EUP math f32 — v5e has no bf16 VPU/EUP).
    m = jnp.max(scores, axis=-1, keepdims=True)
    e = jnp.exp(scores - m)
    denom = jnp.sum(e, axis=-1, keepdims=True)

    if return_attn:
        # Exact reciprocal so the written probabilities sum to 1.
        p = e * pl.reciprocal(denom, approx=False)
        attn_ref[...] = p.astype(attn_ref.dtype).reshape(attn_ref.shape)
        ctx = jnp.dot(p.astype(compute_dtype), v_scr[...],
                      preferred_element_type=jnp.float32)
    else:
        # Normalize after the PV matmul: (tq, d_k) multiplies instead of (tq, Tk).
        ctx = jnp.dot(e.astype(compute_dtype), v_scr[...],
                      preferred_element_type=jnp.float32)
        ctx = ctx * pl.reciprocal(denom, approx=approx_recip)

    # dropout on p_attn: eval mode -> identity.
    out_ref[...] = ctx.astype(out_ref.dtype).reshape(out_ref.shape)


# -------------------------------- module wrapper -------------------------------

def _pick_q_tile(Tq, requested):
    if requested is not None:
        assert Tq % requested == 0, "Tq must be divisible by q_tile"
        assert requested % 8 == 0 or requested == Tq
        return requested
    if Tq <= 256:
        return Tq
    for t in (256, 128, 64, 32, 16, 8):
        if Tq % t == 0:
            return t
    return Tq


def multi_headed_dot_attention(params, query, value, key, mask=None, *, h,
                               scale=1, compute_dtype=jnp.bfloat16,
                               out_dtype=None, attn_dtype=jnp.float32,
                               return_attn=True, q_tile=None):
    """Forward of MultiHeadedDotAttention (project_k_v=1, norm_q=0, do_glu=0)."""
    B, Tq, d_model = query.shape
    Tk = key.shape[1]
    d_out = d_model * scale
    assert d_out % h == 0
    d_k = d_out // h
    cd = jnp.dtype(compute_dtype)
    out_dtype = query.dtype if out_dtype is None else out_dtype

    q_tile = _pick_q_tile(Tq, q_tile)
    n_qt = Tq // q_tile

    # ---- host-side prep (a handful of tiny XLA ops, once per call) ----------
    inv_sqrt_dk = 1.0 / math.sqrt(d_k)

    def head_split(w):  # (d_model, h*d_k) -> (h, d_model, d_k)
        return jnp.transpose(w.reshape(d_model, h, d_k), (1, 0, 2))

    # NOTE: 1/sqrt(d_k) is folded into W_q/b_q in f32 before the compute-dtype
    # cast (slightly different rounding from scaling f32 scores; documented).
    w0 = head_split(params["w0"] * inv_sqrt_dk).astype(cd)
    w1 = head_split(params["w1"]).astype(cd)
    w2 = head_split(params["w2"]).astype(cd)
    b0 = (params["b0"] * inv_sqrt_dk).reshape(h, 1, d_k).astype(jnp.float32)
    b1 = params["b1"].reshape(h, 1, d_k).astype(jnp.float32)
    b2 = params["b2"].reshape(h, 1, d_k).astype(jnp.float32)

    # Additive mask bias (0 / -1e9): one broadcast add in-kernel, no selects.
    # NOTE: matches masked_fill+softmax except for fully-masked rows (reference
    # gives a uniform row there; the additive form gives softmax of raw scores).
    if mask is None:
        bias = jnp.zeros((B, 1, Tk), jnp.float32)
    else:
        m3 = mask if mask.ndim == 3 else mask[:, None, :]
        bias = jnp.where(m3 == 0, -1e9, 0.0).astype(jnp.float32)
    mq = bias.shape[1]
    if mq == 1:
        bias_spec = pl.BlockSpec((1, 1, Tk), lambda b, hh, qt: (b, 0, 0))
    else:
        assert mq == Tq
        bias_spec = pl.BlockSpec((1, q_tile, Tk), lambda b, hh, qt: (b, qt, 0))

    q_in = query.astype(cd)   # -> linears[0] -> query_
    k_in = key.astype(cd)     # -> linears[1] -> key_
    v_in = value.astype(cd)   # -> linears[2] -> value_

    # ---- output layout: lane-dense direct head merge when d_k % 128 == 0 ----
    lane_aligned = (d_k % 128 == 0) or (h == 1)
    if lane_aligned:
        ctx_shape = jax.ShapeDtypeStruct((B, Tq, d_out), out_dtype)
        ctx_spec = pl.BlockSpec((1, q_tile, d_k), lambda b, hh, qt: (b, qt, hh))
    else:
        # TODO(synk): pad d_k to 128 lanes host-side to keep the final store
        # lane-dense instead of this per-head output + XLA merge fallback.
        ctx_shape = jax.ShapeDtypeStruct((B, h, Tq, d_k), out_dtype)
        ctx_spec = pl.BlockSpec((1, 1, q_tile, d_k),
                                lambda b, hh, qt: (b, hh, qt, 0))

    if return_attn:
        out_shape = (ctx_shape, jax.ShapeDtypeStruct((B, h, Tq, Tk), attn_dtype))
        out_specs = (ctx_spec,
                     pl.BlockSpec((1, 1, q_tile, Tk),
                                  lambda b, hh, qt: (b, hh, qt, 0)))
    else:
        out_shape = ctx_shape
        out_specs = ctx_spec

    # ---- per-step VMEM footprint -> scoped VMEM limit ------------------------
    cdb = cd.itemsize
    est = 0
    est += 2 * q_tile * d_model * cdb                       # Q tile (x2 buffers)
    est += 2 * 2 * Tk * d_model * cdb                       # raw K/V (x2 buffers)
    est += 2 * (q_tile if mq != 1 else 1) * Tk * 4          # mask bias
    est += 2 * 3 * (d_model * d_k * cdb + d_k * 4)          # per-head weights/biases
    est += 2 * q_tile * d_k * jnp.dtype(out_dtype).itemsize
    if return_attn:
        est += 2 * q_tile * Tk * jnp.dtype(attn_dtype).itemsize
    est += 2 * Tk * d_k * cdb                               # projected K/V scratch
    est += 6 * q_tile * Tk * 4                              # score/exp temporaries
    vmem_limit = int(min(100 << 20, max(32 << 20, 2 * est)))

    kernel = functools.partial(
        _mha_head_kernel,
        compute_dtype=cd,
        return_attn=return_attn,
        approx_recip=bool(cd != jnp.dtype(jnp.float32)))

    result = pl.pallas_call(
        kernel,
        grid=(B, h, n_qt),
        out_shape=out_shape,
        in_specs=[
            pl.BlockSpec((1, q_tile, d_model), lambda b, hh, qt: (b, qt, 0)),  # query tile
            pl.BlockSpec((1, Tk, d_model), lambda b, hh, qt: (b, 0, 0)),       # key rows
            pl.BlockSpec((1, Tk, d_model), lambda b, hh, qt: (b, 0, 0)),       # value rows
            bias_spec,                                                         # mask bias
            pl.BlockSpec((1, d_model, d_k), lambda b, hh, qt: (hh, 0, 0)),     # W_q head
            pl.BlockSpec((1, 1, d_k), lambda b, hh, qt: (hh, 0, 0)),           # b_q head
            pl.BlockSpec((1, d_model, d_k), lambda b, hh, qt: (hh, 0, 0)),     # W_k head
            pl.BlockSpec((1, 1, d_k), lambda b, hh, qt: (hh, 0, 0)),           # b_k head
            pl.BlockSpec((1, d_model, d_k), lambda b, hh, qt: (hh, 0, 0)),     # W_v head
            pl.BlockSpec((1, 1, d_k), lambda b, hh, qt: (hh, 0, 0)),           # b_v head
        ],
        out_specs=out_specs,
        scratch_shapes=[pltpu.VMEM((Tk, d_k), cd),   # projected K for this (b, head)
                        pltpu.VMEM((Tk, d_k), cd)],  # projected V for this (b, head)
        compiler_params=pltpu.CompilerParams(
            dimension_semantics=("parallel", "parallel", "arbitrary"),
            vmem_limit_bytes=vmem_limit),
    )(q_in, k_in, v_in, bias, w0, b0, w1, b1, w2, b2)

    if return_attn:
        ctx, attn = result
    else:
        ctx, attn = result, None
    if not lane_aligned:
        ctx = jnp.transpose(ctx, (0, 2, 1, 3)).reshape(B, Tq, d_out)

    # NOTE: the reference forward never applies self.output_layer.
    # TODO(synk): single_query (2-D query) path with SublayerConnection +
    # PositionwiseFeedForward, GLU and norm_q branches are not taken with 3-D
    # query / default flags and are not implemented.
    return ctx, attn


# ------------------------------ deterministic init ----------------------------

def init_params(rng, d_model, scale=1):
    d_out = d_model * scale
    bound = 1.0 / math.sqrt(d_model)   # matches nn.Linear default uniform bound
    keys = jax.random.split(rng, 6)
    params = {}
    for i in range(3):
        params[f"w{i}"] = jax.random.uniform(
            keys[2 * i], (d_model, d_out), jnp.float32, minval=-bound, maxval=bound)
        params[f"b{i}"] = jax.random.uniform(
            keys[2 * i + 1], (d_out,), jnp.float32, minval=-bound, maxval=bound)
    return params       # weights stored as W^T: y = x @ w + b


# --------------------------------- reference -----------------------------------

def reference(params, query, value, key, mask, *, h, scale=1):
    B, Tq, d_model = query.shape
    Tk = key.shape[1]
    d_out = d_model * scale
    d_k = d_out // h
    hp = jax.lax.Precision.HIGHEST

    def lin(x, w, b):
        return jnp.einsum("btd,df->btf", x, w, precision=hp) + b

    # zip(linears, (query, key, value)) with forward args (query, value, key):
    q_ = lin(query, params["w0"], params["b0"]).reshape(B, Tq, h, d_k).transpose(0, 2, 1, 3)
    k_ = lin(key,   params["w1"], params["b1"]).reshape(B, Tk, h, d_k).transpose(0, 2, 1, 3)
    v_ = lin(value, params["w2"], params["b2"]).reshape(B, Tk, h, d_k).transpose(0, 2, 1, 3)

    scores = jnp.einsum("bhqd,bhkd->bhqk", q_, k_, precision=hp) / math.sqrt(d_k)
    if mask is not None:
        m4 = mask[:, None, None, :] if mask.ndim == 2 else mask[:, None, :, :]
        scores = jnp.where(m4 == 0, -1e9, scores)
    p = jax.nn.softmax(scores, axis=-1)
    x = jnp.einsum("bhqk,bhkd->bhqd", p, v_, precision=hp)
    x = x.transpose(0, 2, 1, 3).reshape(B, Tq, d_out)
    return x, p


# ------------------------------------ main --------------------------------------

def _make_inputs(rng, B, Tq, Tk, d_model):
    ks = jax.random.split(rng, 5)
    query = jax.random.normal(ks[0], (B, Tq, d_model), jnp.float32)
    value = jax.random.normal(ks[1], (B, Tk, d_model), jnp.float32)
    key_in = jax.random.normal(ks[2], (B, Tk, d_model), jnp.float32)
    mask = (jax.random.uniform(ks[3], (B, Tk)) > 0.25).astype(jnp.int32)
    mask = mask.at[:, 0].set(1)      # ensure at least one valid key per row
    return query, value, key_in, mask, ks[4]


if __name__ == "__main__":
    root = jax.random.PRNGKey(0)

    # ---- config A: d_k = 128 (lane-aligned direct head-merge output path) ----
    B, Tq, Tk, d_model, h, scale = 2, 16, 16, 256, 2, 1
    query, value, key_in, mask, pk = _make_inputs(root, B, Tq, Tk, d_model)
    params = init_params(pk, d_model, scale)
    x_ref, a_ref = reference(params, query, value, key_in, mask, h=h, scale=scale)

    # 1) f32 compute path: tight correctness check.
    x32, a32 = multi_headed_dot_attention(params, query, value, key_in, mask,
                                          h=h, scale=scale,
                                          compute_dtype=jnp.float32, q_tile=8)
    jax.block_until_ready((x32, a32))
    assert x32.shape == (B, Tq, d_model * scale)
    assert a32.shape == (B, h, Tq, Tk)
    assert jnp.allclose(x32, x_ref, atol=5e-4, rtol=5e-4), \
        float(jnp.max(jnp.abs(x32 - x_ref)))
    assert jnp.allclose(a32, a_ref, atol=5e-4, rtol=5e-4), \
        float(jnp.max(jnp.abs(a32 - a_ref)))

    # 2) bf16 MXU-operand path (f32 accumulation / f32 softmax): relaxed check.
    xb, ab = multi_headed_dot_attention(params, query, value, key_in, mask,
                                        h=h, scale=scale,
                                        compute_dtype=jnp.bfloat16, q_tile=8)
    jax.block_until_ready((xb, ab))
    assert jnp.allclose(xb, x_ref, atol=5e-2, rtol=5e-2), \
        float(jnp.max(jnp.abs(xb - x_ref)))
    assert jnp.allclose(ab, a_ref, atol=5e-2, rtol=5e-2), \
        float(jnp.max(jnp.abs(ab - a_ref)))

    # 3) attn-writeback skipped (post-PV normalization, approx reciprocal).
    xo, ao = multi_headed_dot_attention(params, query, value, key_in, mask,
                                        h=h, scale=scale,
                                        compute_dtype=jnp.bfloat16, q_tile=8,
                                        return_attn=False)
    jax.block_until_ready(xo)
    assert ao is None
    assert jnp.allclose(xo, x_ref, atol=5e-2, rtol=5e-2), \
        float(jnp.max(jnp.abs(xo - x_ref)))

    # ---- config B: d_k = 64 (< 128 lanes), scale = 2 -> per-head output + merge ----
    B, Tq, Tk, d_model, h, scale = 2, 16, 16, 128, 4, 2
    query, value, key_in, mask, pk = _make_inputs(jax.random.fold_in(root, 1),
                                                  B, Tq, Tk, d_model)
    params = init_params(pk, d_model, scale)
    x_ref, a_ref = reference(params, query, value, key_in, mask, h=h, scale=scale)

    x2, a2 = multi_headed_dot_attention(params, query, value, key_in, mask,
                                        h=h, scale=scale,
                                        compute_dtype=jnp.float32, q_tile=8)
    jax.block_until_ready((x2, a2))
    assert x2.shape == (B, Tq, d_model * scale)
    assert jnp.allclose(x2, x_ref, atol=5e-4, rtol=5e-4), \
        float(jnp.max(jnp.abs(x2 - x_ref)))
    assert jnp.allclose(a2, a_ref, atol=5e-4, rtol=5e-4), \
        float(jnp.max(jnp.abs(a2 - a_ref)))

    print("KERNEL_OK")
</pallas_src>

<mosaic_0001>
module attributes {stable_mosaic.version = 11 : i64} {
  func.func @_mha_head_kernel(%arg0: i32, %arg1: i32, %arg2: i32, %arg3: memref<1x8x256xf32, #tpu.memory_space<vmem>>, %arg4: memref<1x16x256xf32, #tpu.memory_space<vmem>>, %arg5: memref<1x16x256xf32, #tpu.memory_space<vmem>>, %arg6: memref<1x1x16xf32, #tpu.memory_space<vmem>>, %arg7: memref<1x256x128xf32, #tpu.memory_space<vmem>>, %arg8: memref<1x1x128xf32, #tpu.memory_space<vmem>>, %arg9: memref<1x256x128xf32, #tpu.memory_space<vmem>>, %arg10: memref<1x1x128xf32, #tpu.memory_space<vmem>>, %arg11: memref<1x256x128xf32, #tpu.memory_space<vmem>>, %arg12: memref<1x1x128xf32, #tpu.memory_space<vmem>>, %arg13: memref<1x8x128xf32, #tpu.memory_space<vmem>>, %arg14: memref<1x1x8x16xf32, #tpu.memory_space<vmem>>, %arg15: memref<16x128xf32, #tpu.memory_space<vmem>>, %arg16: memref<16x128xf32, #tpu.memory_space<vmem>>) attributes {dimension_semantics = [#tpu.dimension_semantics<parallel>, #tpu.dimension_semantics<parallel>, #tpu.dimension_semantics<arbitrary>], iteration_bounds = array<i64: 2, 2, 2>, scalar_prefetch = 0 : i64, scratch_operands = 2 : i64, tpu.core_type = #tpu.core_type<tc>, window_params = [{transform_indices = @transform_0, window_bounds = array<i64: 1, 8, 256>}, {transform_indices = @transform_1, window_bounds = array<i64: 1, 16, 256>}, {transform_indices = @transform_2, window_bounds = array<i64: 1, 16, 256>}, {transform_indices = @transform_3, window_bounds = array<i64: 1, 1, 16>}, {transform_indices = @transform_4, window_bounds = array<i64: 1, 256, 128>}, {transform_indices = @transform_5, window_bounds = array<i64: 1, 1, 128>}, {transform_indices = @transform_6, window_bounds = array<i64: 1, 256, 128>}, {transform_indices = @transform_7, window_bounds = array<i64: 1, 1, 128>}, {transform_indices = @transform_8, window_bounds = array<i64: 1, 256, 128>}, {transform_indices = @transform_9, window_bounds = array<i64: 1, 1, 128>}, {transform_indices = @transform_10, window_bounds = array<i64: 1, 8, 128>}, {transform_indices = @transform_11, window_bounds = array<i64: 1, 1, 8, 16>}]} {
    %c0_i32 = arith.constant 0 : i32
    %0 = arith.cmpi eq, %arg2, %c0_i32 : i32
    %1 = arith.extui %0 : i1 to i32
    %c0_i32_0 = arith.constant 0 : i32
    %2 = arith.cmpi ne, %1, %c0_i32_0 : i32
    scf.if %2 {
      %c0_27 = arith.constant 0 : index
      %c0_28 = arith.constant 0 : index
      %c0_29 = arith.constant 0 : index
      %34 = vector.load %arg4[%c0_27, %c0_28, %c0_29] : memref<1x16x256xf32, #tpu.memory_space<vmem>>, vector<1x16x256xf32>
      %35 = vector.shape_cast %34 : vector<1x16x256xf32> to vector<16x256xf32>
      %c0_30 = arith.constant 0 : index
      %c0_31 = arith.constant 0 : index
      %c0_32 = arith.constant 0 : index
      %36 = vector.load %arg9[%c0_30, %c0_31, %c0_32] : memref<1x256x128xf32, #tpu.memory_space<vmem>>, vector<1x256x128xf32>
      %37 = vector.shape_cast %36 : vector<1x256x128xf32> to vector<256x128xf32>
      %cst_33 = arith.constant dense<0.000000e+00> : vector<16x128xf32>
      %38 = tpu.matmul %35, %37, %cst_33 {dimension_numbers = #tpu.dot_dimension_numbers<[1], [0], [0], [1], [0, 0, 1, 1], [], []>} : vector<16x256xf32>, vector<256x128xf32>, vector<16x128xf32> -> vector<16x128xf32>
      %c0_34 = arith.constant 0 : index
      %c0_35 = arith.constant 0 : index
      %c0_36 = arith.constant 0 : index
      %39 = vector.load %arg10[%c0_34, %c0_35, %c0_36] : memref<1x1x128xf32, #tpu.memory_space<vmem>>, vector<1x1x128xf32>
      %40 = vector.shape_cast %39 : vector<1x1x128xf32> to vector<1x128xf32>
      %41 = vector.broadcast %40 : vector<1x128xf32> to vector<16x128xf32>
      %42 = arith.addf %38, %41 : vector<16x128xf32>
      %c0_37 = arith.constant 0 : index
      %c0_38 = arith.constant 0 : index
      %c0_39 = arith.constant 0 : index
      %43 = vector.load %arg5[%c0_37, %c0_38, %c0_39] : memref<1x16x256xf32, #tpu.memory_space<vmem>>, vector<1x16x256xf32>
      %44 = vector.shape_cast %43 : vector<1x16x256xf32> to vector<16x256xf32>
      %c0_40 = arith.constant 0 : index
      %c0_41 = arith.constant 0 : index
      %c0_42 = arith.constant 0 : index
      %45 = vector.load %arg11[%c0_40, %c0_41, %c0_42] : memref<1x256x128xf32, #tpu.memory_space<vmem>>, vector<1x256x128xf32>
      %46 = vector.shape_cast %45 : vector<1x256x128xf32> to vector<256x128xf32>
      %cst_43 = arith.constant dense<0.000000e+00> : vector<16x128xf32>
      %47 = tpu.matmul %44, %46, %cst_43 {dimension_numbers = #tpu.dot_dimension_numbers<[1], [0], [0], [1], [0, 0, 1, 1], [], []>} : vector<16x256xf32>, vector<256x128xf32>, vector<16x128xf32> -> vector<16x128xf32>
      %c0_44 = arith.constant 0 : index
      %c0_45 = arith.constant 0 : index
      %c0_46 = arith.constant 0 : index
      %48 = vector.load %arg12[%c0_44, %c0_45, %c0_46] : memref<1x1x128xf32, #tpu.memory_space<vmem>>, vector<1x1x128xf32>
      %49 = vector.shape_cast %48 : vector<1x1x128xf32> to vector<1x128xf32>
      %50 = vector.broadcast %49 : vector<1x128xf32> to vector<16x128xf32>
      %51 = arith.addf %47, %50 : vector<16x128xf32>
      %c0_47 = arith.constant 0 : index
      %c0_48 = arith.constant 0 : index
      %52 = vector.load %arg15[%c0_47, %c0_48] : memref<16x128xf32, #tpu.memory_space<vmem>>, vector<16x128xf32>
      tpu.vector_store %arg15[%c0_47, %c0_48], %42 {strides = array<i32>} : memref<16x128xf32, #tpu.memory_space<vmem>>, vector<16x128xf32>,
      %c0_49 = arith.constant 0 : index
      %c0_50 = arith.constant 0 : index
      %53 = vector.load %arg16[%c0_49, %c0_50] : memref<16x128xf32, #tpu.memory_space<vmem>>, vector<16x128xf32>
      tpu.vector_store %arg16[%c0_49, %c0_50], %51 {strides = array<i32>} : memref<16x128xf32, #tpu.memory_space<vmem>>, vector<16x128xf32>,
    } else {
    }
    %c0 = arith.constant 0 : index
    %c0_1 = arith.constant 0 : index
    %c0_2 = arith.constant 0 : index
    %3 = vector.load %arg3[%c0, %c0_1, %c0_2] : memref<1x8x256xf32, #tpu.memory_space<vmem>>, vector<1x8x256xf32>
    %4 = vector.shape_cast %3 : vector<1x8x256xf32> to vector<8x256xf32>
    %c0_3 = arith.constant 0 : index
    %c0_4 = arith.constant 0 : index
    %c0_5 = arith.constant 0 : index
    %5 = vector.load %arg7[%c0_3, %c0_4, %c0_5] : memref<1x256x128xf32, #tpu.memory_space<vmem>>, vector<1x256x128xf32>
    %6 = vector.shape_cast %5 : vector<1x256x128xf32> to vector<256x128xf32>
    %cst = arith.constant dense<0.000000e+00> : vector<8x128xf32>
    %7 = tpu.matmul %4, %6, %cst {dimension_numbers = #tpu.dot_dimension_numbers<[1], [0], [0], [1], [0, 0, 1, 1], [], []>} : vector<8x256xf32>, vector<256x128xf32>, vector<8x128xf32> -> vector<8x128xf32>
    %c0_6 = arith.constant 0 : index
    %c0_7 = arith.constant 0 : index
    %c0_8 = arith.constant 0 : index
    %8 = vector.load %arg8[%c0_6, %c0_7, %c0_8] : memref<1x1x128xf32, #tpu.memory_space<vmem>>, vector<1x1x128xf32>
    %9 = vector.shape_cast %8 : vector<1x1x128xf32> to vector<1x128xf32>
    %10 = vector.broadcast %9 : vector<1x128xf32> to vector<8x128xf32>
    %11 = arith.addf %7, %10 : vector<8x128xf32>
    %c0_9 = arith.constant 0 : index
    %c0_10 = arith.constant 0 : index
    %12 = vector.load %arg15[%c0_9, %c0_10] : memref<16x128xf32, #tpu.memory_space<vmem>>, vector<16x128xf32>
    %cst_11 = arith.constant dense<0.000000e+00> : vector<8x16xf32>
    %13 = tpu.matmul %11, %12, %cst_11 {dimension_numbers = #tpu.dot_dimension_numbers<[1], [1], [0], [0], [0, 0, 1, 0], [], []>} : vector<8x128xf32>, vector<16x128xf32>, vector<8x16xf32> -> vector<8x16xf32>
    %c0_12 = arith.constant 0 : index
    %c0_13 = arith.constant 0 : index
    %c0_14 = arith.constant 0 : index
    %14 = vector.load %arg6[%c0_12, %c0_13, %c0_14] : memref<1x1x16xf32, #tpu.memory_space<vmem>>, vector<1x1x16xf32>
    %15 = vector.shape_cast %14 : vector<1x1x16xf32> to vector<1x16xf32>
    %16 = vector.broadcast %15 : vector<1x16xf32> to vector<8x16xf32>
    %17 = arith.addf %13, %16 : vector<8x16xf32>
    %cst_15 = arith.constant dense<0xFF800000> : vector<8xf32>
    %18 = vector.multi_reduction <maximumf>, %17, %cst_15 [1] : vector<8x16xf32> to vector<8xf32>
    %19 = vector.shape_cast %18 : vector<8xf32> to vector<8x1xf32>
    %20 = vector.broadcast %19 : vector<8x1xf32> to vector<8x16xf32>
    %21 = arith.subf %17, %20 : vector<8x16xf32>
    %22 = math.exp %21 : vector<8x16xf32>
    %cst_16 = arith.constant dense<0.000000e+00> : vector<8xf32>
    %23 = vector.multi_reduction <add>, %22, %cst_16 [1] : vector<8x16xf32> to vector<8xf32>
    %24 = vector.shape_cast %23 : vector<8xf32> to vector<8x1xf32>
    %25 = tpu.reciprocal %24 : vector<8x1xf32> -> vector<8x1xf32>
    %26 = vector.broadcast %25 : vector<8x1xf32> to vector<8x16xf32>
    %27 = arith.mulf %22, %26 : vector<8x16xf32>
    %28 = vector.shape_cast %27 : vector<8x16xf32> to vector<1x1x8x16xf32>
    %c0_17 = arith.constant 0 : index
    %c0_18 = arith.constant 0 : index
    %c0_19 = arith.constant 0 : index
    %c0_20 = arith.constant 0 : index
    %29 = vector.load %arg14[%c0_17, %c0_18, %c0_19, %c0_20] : memref<1x1x8x16xf32, #tpu.memory_space<vmem>>, vector<1x1x8x16xf32>
    tpu.vector_store %arg14[%c0_17, %c0_18, %c0_19, %c0_20], %28 {strides = array<i32>} : memref<1x1x8x16xf32, #tpu.memory_space<vmem>>, vector<1x1x8x16xf32>,
    %c0_21 = arith.constant 0 : index
    %c0_22 = arith.constant 0 : index
    %30 = vector.load %arg16[%c0_21, %c0_22] : memref<16x128xf32, #tpu.memory_space<vmem>>, vector<16x128xf32>
    %cst_23 = arith.constant dense<0.000000e+00> : vector<8x128xf32>
    %31 = tpu.matmul %27, %30, %cst_23 {dimension_numbers = #tpu.dot_dimension_numbers<[1], [0], [0], [1], [0, 0, 1, 1], [], []>} : vector<8x16xf32>, vector<16x128xf32>, vector<8x128xf32> -> vector<8x128xf32>
    %32 = vector.shape_cast %31 : vector<8x128xf32> to vector<1x8x128xf32>
    %c0_24 = arith.constant 0 : index
    %c0_25 = arith.constant 0 : index
    %c0_26 = arith.constant 0 : index
    %33 = vector.load %arg13[%c0_24, %c0_25, %c0_26] : memref<1x8x128xf32, #tpu.memory_space<vmem>>, vector<1x8x128xf32>
    tpu.vector_store %arg13[%c0_24, %c0_25, %c0_26], %32 {strides = array<i32>} : memref<1x8x128xf32, #tpu.memory_space<vmem>>, vector<1x8x128xf32>,
    return
  }
  func.func @transform_0(%arg0: i32, %arg1: i32, %arg2: i32) -> (i32, i32, i32) {
    %c0_i32 = arith.constant 0 : i32
    %c0_i32_0 = arith.constant 0 : i32
    return %arg0, %arg2, %c0_i32 : i32, i32, i32
  }
  func.func @transform_1(%arg0: i32, %arg1: i32, %arg2: i32) -> (i32, i32, i32) {
    %c0_i32 = arith.constant 0 : i32
    %c0_i32_0 = arith.constant 0 : i32
    %c0_i32_1 = arith.constant 0 : i32
    return %arg0, %c0_i32, %c0_i32_0 : i32, i32, i32
  }
  func.func @transform_2(%arg0: i32, %arg1: i32, %arg2: i32) -> (i32, i32, i32) {
    %c0_i32 = arith.constant 0 : i32
    %c0_i32_0 = arith.constant 0 : i32
    %c0_i32_1 = arith.constant 0 : i32
    return %arg0, %c0_i32, %c0_i32_0 : i32, i32, i32
  }
  func.func @transform_3(%arg0: i32, %arg1: i32, %arg2: i32) -> (i32, i32, i32) {
    %c0_i32 = arith.constant 0 : i32
    %c0_i32_0 = arith.constant 0 : i32
    %c0_i32_1 = arith.constant 0 : i32
    return %arg0, %c0_i32, %c0_i32_0 : i32, i32, i32
  }
  func.func @transform_4(%arg0: i32, %arg1: i32, %arg2: i32) -> (i32, i32, i32) {
    %c0_i32 = arith.constant 0 : i32
    %c0_i32_0 = arith.constant 0 : i32
    %c0_i32_1 = arith.constant 0 : i32
    return %arg1, %c0_i32, %c0_i32_0 : i32, i32, i32
  }
  func.func @transform_5(%arg0: i32, %arg1: i32, %arg2: i32) -> (i32, i32, i32) {
    %c0_i32 = arith.constant 0 : i32
    %c0_i32_0 = arith.constant 0 : i32
    %c0_i32_1 = arith.constant 0 : i32
    return %arg1, %c0_i32, %c0_i32_0 : i32, i32, i32
  }
  func.func @transform_6(%arg0: i32, %arg1: i32, %arg2: i32) -> (i32, i32, i32) {
    %c0_i32 = arith.constant 0 : i32
    %c0_i32_0 = arith.constant 0 : i32
    %c0_i32_1 = arith.constant 0 : i32
    return %arg1, %c0_i32, %c0_i32_0 : i32, i32, i32
  }
  func.func @transform_7(%arg0: i32, %arg1: i32, %arg2: i32) -> (i32, i32, i32) {
    %c0_i32 = arith.constant 0 : i32
    %c0_i32_0 = arith.constant 0 : i32
    %c0_i32_1 = arith.constant 0 : i32
    return %arg1, %c0_i32, %c0_i32_0 : i32, i32, i32
  }
  func.func @transform_8(%arg0: i32, %arg1: i32, %arg2: i32) -> (i32, i32, i32) {
    %c0_i32 = arith.constant 0 : i32
    %c0_i32_0 = arith.constant 0 : i32
    %c0_i32_1 = arith.constant 0 : i32
    return %arg1, %c0_i32, %c0_i32_0 : i32, i32, i32
  }
  func.func @transform_9(%arg0: i32, %arg1: i32, %arg2: i32) -> (i32, i32, i32) {
    %c0_i32 = arith.constant 0 : i32
    %c0_i32_0 = arith.constant 0 : i32
    %c0_i32_1 = arith.constant 0 : i32
    return %arg1, %c0_i32, %c0_i32_0 : i32, i32, i32
  }
  func.func @transform_10(%arg0: i32, %arg1: i32, %arg2: i32) -> (i32, i32, i32) {
    %c0_i32 = arith.constant 0 : i32
    return %arg0, %arg2, %arg1 : i32, i32, i32
  }
  func.func @transform_11(%arg0: i32, %arg1: i32, %arg2: i32) -> (i32, i32, i32, i32) {
    %c0_i32 = arith.constant 0 : i32
    %c0_i32_0 = arith.constant 0 : i32
    return %arg0, %arg1, %arg2, %c0_i32 : i32, i32, i32, i32
  }
}

</mosaic_0001>

<bundles_post_ra>
// kernel: tpu_custom_call.1
= control target key start
LH: loop header
LB: loop body
LE: loop exit
PB: predicated region body
PF: predicated region fallthrough
CT: control target
= control target key end

     0   :  { %s3417_s0 = inlined_call_operand.hbm [shape: f32[2,16,256], index: 0, kind: input, shape index: {}]   ;;  %s3418_s1 = inlined_call_operand.hbm [shape: f32[2,16,256], index: 1, kind: input, shape index: {}]   ;;  %s3419_s2 = inlined_call_operand.hbm [shape: f32[2,16,256], index: 2, kind: input, shape index: {}]   ;;  %s3420_s3 = inlined_call_operand.vmem [shape: f32[2,1,16], index: 3, kind: input, shape index: {}]   ;;  %s3421_s4 = inlined_call_operand.hbm [shape: f32[2,256,128], index: 4, kind: input, shape index: {}]   ;;  %s3422_s5 = inlined_call_operand.vmem [shape: f32[2,1,128], index: 5, kind: input, shape index: {}]   ;;  %s3423_s6 = inlined_call_operand.hbm [shape: f32[2,256,128], index: 6, kind: input, shape index: {}]   ;;  %s3424_s7 = inlined_call_operand.vmem [shape: f32[2,1,128], index: 7, kind: input, shape index: {}]   ;;  %s3425_s8 = inlined_call_operand.hbm [shape: f32[2,256,128], index: 8, kind: input, shape index: {}]   ;;  %s3426_s9 = inlined_call_operand.vmem [shape: f32[2,1,128], index: 9, kind: input, shape index: {}]   ;;  %s3427_s10 = inlined_call_operand.hbm [shape: f32[2,16,256], index: 10, kind: output, shape index: {0}]   ;;  %s3428_s11 = inlined_call_operand.hbm [shape: f32[2,2,16,16], index: 11, kind: output, shape index: {1}]  }
   0x1   :  { %3503 = sst [smem:[#allocation64_spill]] %s3417_s0 }
   0x2   :  { %3504 = sst [smem:[#allocation65_spill]] %s3418_s1 }
   0x3   :  { %3505 = sst [smem:[#allocation66_spill]] %s3419_s2 }
   0x4   :  { %3506 = sst [smem:[#allocation67_spill]] %s3420_s3 }
   0x5   :  { %3507 = sst [smem:[#allocation68_spill]] %s3421_s4 }
   0x6   :  { %3508 = sst [smem:[#allocation69_spill]] %s3422_s5 }
   0x7   :  { %3509 = sst [smem:[#allocation70_spill]] %s3423_s6 }
   0x8   :  { %3510 = sst [smem:[#allocation71_spill]] %s3424_s7 }
   0x9   :  { %3511 = sst [smem:[#allocation72_spill]] %s3425_s8 }
   0xa   :  { %3512 = sst [smem:[#allocation73_spill]] %s3426_s9 }
   0xb   :  { %3513 = sst [smem:[#allocation74_spill]] %s3427_s10 }
   0xc   :  { %3514 = sst [smem:[#allocation75_spill]] %s3428_s11 }
   0xd   :  { %17 = vsyncpa [#allocation5], 0 }
   0xe   :  { %19 = vsyncpa [#allocation5 + $0x1], 0 }
   0xf   :  { %20 = vsyncpa [#allocation8], 0 }
  0x10   :  { %22 = vsyncpa [#allocation8 + $0x1], 0 }
  0x11   :  { %23 = vsyncpa [#allocation11], 0 }
  0x12   :  { %25 = vsyncpa [#allocation11 + $0x1], 0 }
  0x13   :  { %26 = vsyncpa [#allocation14], 0 }
  0x14   :  { %28 = vsyncpa [#allocation14 + $0x1], 0 }
  0x15   :  { %29 = vsyncpa [#allocation6], 0 }
  0x16   :  { %31 = vsyncpa [#allocation6 + $0x1], 0 }
  0x17   :  { %32 = vsyncpa [#allocation17], 0 }
  0x18   :  { %34 = vsyncpa [#allocation17 + $0x1], 0  ;;  %s2561_s17 = smov 0   ;;  %s2563_s18 = smov 0  }
  0x19   :  { %s2565_s19 = smov 0   ;;  %s2567_s20 = smov 0  }
  0x1a   :  { %s2569_s21 = smov 0   ;;  %s2571_s22 = smov 0  }
  0x1b   :  { %s2573_s23 = smov 0   ;;  %s2575_s24 = smov 0  }
  0x1c   :  { %s2577_s25 = smov 0   ;;  %s2579_s26 = smov 0  }
  0x1d   :  { %s2581_s27 = smov 0   ;;  %s2583_s28 = smov 0  }
  0x1e   :  { %s2585_s29 = smov 0   ;;  %s2587_s30 = smov 0  }
  0x1f   :  { %s2589_s12 = smov 0   ;;  %s2591_s13 = smov 0  }
  0x20   :  { %s2593_s14 = smov 0   ;;  %s2595_s15 = smov 0  }
  0x21   :  { %s2597_s16 = smov 0   ;;  %s2599_s10 = smov 0  }
  0x22   :  { %s2601_s11 = smov 0   ;;  %s2603_s9 = smov 0  }
  0x23 LB: > { %3515 = sst [smem:[#allocation24_spill]] %s2400_s17  ;;  %p3455_p0 = scmp.eq.s32.totalorder %s2484_s9, 0  ;;  %s2484_s9 = sphi %s2603_s9, %s40_s9   ;;  %s2480_s11 = sphi %s2601_s11, %s3676_s11   ;;  %s2476_s10 = sphi %s2599_s10, %s3674_s10   ;;  %s2472_s16 = sphi %s2597_s16, %s3672_s16   ;;  %s2468_s15 = sphi %s2595_s15, %s3671_s15   ;;  %s2464_s14 = sphi %s2593_s14, %s3670_s14   ;;  %s2460_s13 = sphi %s2591_s13, %s3669_s13   ;;  %s2456_s12 = sphi %s2589_s12, %s3678_s12   ;;  %s2452_s30 = sphi %s2587_s30, %s3677_s30   ;;  %s2448_s29 = sphi %s2585_s29, %s3666_s29   ;;  %s2444_s28 = sphi %s2583_s28, %s3665_s28   ;;  %s2440_s27 = sphi %s2581_s27, %s3664_s27   ;;  %s2436_s26 = sphi %s2579_s26, %s3663_s26   ;;  %s2432_s25 = sphi %s2577_s25, %s3662_s25   ;;  %s2428_s24 = sphi %s2575_s24, %s3661_s24   ;;  %s2424_s23 = sphi %s2573_s23, %s3660_s23   ;;  %s2420_s22 = sphi %s2571_s22, %s3659_s22   ;;  %s2416_s21 = sphi %s2569_s21, %s3675_s21   ;;  %s2412_s20 = sphi %s2567_s20, %s3673_s20   ;;  %s2408_s19 = sphi %s2565_s19, %s3657_s19   ;;  %s2404_s18 = sphi %s2563_s18, %s3656_s18   ;;  %s2400_s17 = sphi %s2561_s17, %s3655_s17  }
  0x24   : > { %3516 = sst [smem:[#allocation25_spill]] %s2404_s18  ;;  %p101_p1 = scmp.ne.s32.totalorder %s2444_s28, %s2440_s27 }
  0x25   : > { %3517 = sst [smem:[#allocation26_spill]] %s2408_s19  ;;  %p3443_p3 = scmp.lt.s32.totalorder %s2484_s9, 8 }
  0x26   : > { %3518 = sst [smem:[#allocation27_spill]] %s2412_s20  ;;  %p103_p4 = por %p101_p1, %p3455_p0 }
  0x27   : > { %3519 = sst [smem:[#allocation28_spill]] %s2420_s22  ;;  %s422_s5 = sand.u32 1, %s2444_s28  }
  0x28   : > { %3520 = sst [smem:[#allocation29_spill]] %s2428_s24  ;;  %s2682_s3 = sshll.u32 %s422_s5, 5 }
  0x29   : > { %3521 = sst [smem:[#allocation30_spill]] %s2432_s25  ;;  %s3533_s1 = sld [smem:[#allocation65_spill]] }
  0x2a   : > { %3522 = sst [smem:[#allocation31_spill]] %s2440_s27  ;;  %p2695_p5 = pnand %p3443_p3, %p103_p4 }
  0x2b   : > { %3523 = sst [smem:[#allocation32_spill]] %s2444_s28  ;;  %s3536_s5 = sand.u32 1, %s2484_s9  }
  0x2c   : > { %3524 = sst [smem:[#allocation33_spill]] %s2452_s30  ;;  %s2703_s17 = scalar_lea.sflag [#allocation8], %s3536_s5 }
  0x2d   : > { %3525 = sst [smem:[#allocation34_spill]] %s2456_s12  ;;  %p3454_p7 = pneg %p2695_p5 }
  0x2e   : > { %3526 = sst [smem:[#allocation35_spill]] %s2460_s13  ;;  %s424_s13 = scalar_lea.vmem [#allocation7], %s2682_s3 }
  0x2f   : > { %3527 = sst [smem:[#allocation36_spill]] %s2464_s14  ;;  %s3439_s14 = sshll.u32 %s2480_s11, 9 }
  0x30   : > { %3528 = sst [smem:[#allocation37_spill]] %s2468_s15  ;;  %s2690_s6 = scalar_lea.hbm %s3533_s1, %s3439_s14 }
  0x31   : > { %3529 = sst [smem:[#allocation38_spill]] %s2472_s16  ;;  %s431_s0 = sshll.u32 %s424_s13, 4  ;;  %s2699_s0 = int_to_ptr.vmem [resolvable:$true] %s431_s0 }
  0x32   : > { %3530 = sst [smem:[#allocation39_spill]] %s2476_s10  ;;  %s2050_s8 = scalar_lea.hbm %s2690_s6, 512 }
  0x33   : > { %3531 = sst [smem:[#allocation40_spill]] %s2480_s11  ;;  %p2051_p6 = scmp.ne.s32.totalorder %s2690_s6, %s2050_s8 }
  0x34   : > { %3532 = sst [smem:[#allocation41_spill]] %s2484_s9  ;;  %s2055_s14 = scalar_lea.hbm %s3533_s1, 1024 }
  0x35   : > { %s3534_s7 = scalar_select %p2695_p5, 1, 0 }
  0x36   : > { %3537 = sst [smem:[#allocation43_spill]] %s2703_s17  ;;  %p2053_p8 = pnand %p3454_p7, %p2051_p6 }
  0x37   : > { %3535 = sst [smem:[#allocation42_spill]] %s3534_s7  ;;  %p2056_p10 = scmp.lt.u32.totalorder %s2690_s6, %s3533_s1 }
  0x38   : > { %p2054_p9 = pneg %p2053_p8  ;;  %p2057_p11 = scmp.lt.u32.totalorder %s2055_s14, %s2050_s8 }
  0x39   : > { %p2059_p13 = scmp.lt.u32.totalorder %s2050_s8, %s2690_s6 }
  0x3a   : > { %p2058_p12 = por %p2057_p11, %p2056_p10 }
  0x3c   : > { %p2060_p1 = por %p2059_p13, %p2058_p12 }
  0x3e   : > { %p2061_p4 = pnand %p2060_p1, %p2054_p9 }
  0x40   : > { %2064 = shalt.err (!%p2061_p4)
}
  0x41   : > { %s2065_s5 = scalar_lea.vmem %s2699_s0, 512  ;;  %s2486_s13 = smov [#allocation7]  }
  0x42   : > { %p2066_p6 = scmp.ne.s32.totalorder %s2699_s0, %s2065_s5  ;;  %s2070_s15 = sshll.u32 %s2486_s13, 4  ;;  %s2071_s15 = int_to_ptr.vmem [resolvable:$false] %s2070_s15 }
  0x43   : > { %s2072_s18 = scalar_lea.vmem %s2071_s15, 1024  ;;  %p2073_p3 = scmp.lt.s32.totalorder %s2699_s0, %s2071_s15 }
  0x44   : > { %p2068_p8 = pnand %p2066_p6, %p3454_p7  ;;  %p2074_p10 = scmp.lt.s32.totalorder %s2072_s18, %s2065_s5 }
  0x46   : > { %p2069_p2 = pneg %p2068_p8  ;;  %p2075_p11 = por %p2074_p10, %p2073_p3 }
  0x48   : > { %p2076_p12 = pnand %p2075_p11, %p2069_p2 }
  0x4a   : > { %2079 = shalt.err (!%p2076_p12)
}
  0x4b   : > { %s3446_s19 = smov 256   ;;  %s3448_s14 = smov 16  }
  0x4c   : > { %1841 = dma.hbm_to_vmem [thread:$0]  (!%p2695_p5), %s2690_s6, 512, %s2699_s0, %s2703_s17, %s3446_s19, %s3446_s19, %s3448_s14  }
  0x4d   : > { %s3538_s8 = sshll.u32 %s2480_s11, 9  ;;  %s3539_s2 = sld [smem:[#allocation66_spill]] }
  0x4e   : > { %s445_s18 = scalar_lea.vmem [#allocation9], %s2682_s3  ;;  %p1556_p2 = scmp.ge.s32.totalorder %s2484_s9, 1 }
  0x4f   : > { %s452_s1 = sshll.u32 %s445_s18, 4  ;;  %p547_p3 = scmp.lt.s32.totalorder %s2484_s9, 9  ;;  %s2743_s1 = int_to_ptr.vmem [resolvable:$true] %s452_s1 }
  0x50   : > { %3540 = sst [smem:[#allocation44_spill]] %s2743_s1  ;;  %p179_p13 = scmp.ne.s32.totalorder %s2432_s25, %s2428_s24 }
  0x51   : > { %p2746_p9 = pnand %p1556_p2, %p547_p3  ;;  %s3447_s0 = sand.u32 1, %s2432_s25  }
  0x52   : > { %p181_p4 = por %p179_p13, %p3455_p0  ;;  %s2760_s6 = sshll.u32 %s3447_s0, 8 }
  0x53   : > { %s2739_s15 = scalar_lea.hbm %s3539_s2, %s3538_s8  ;;  %3543 = sst [smem:[#allocation46_spill]] %s2760_s6 }
  0x54   : > { %s3541_s7 = scalar_select %p2746_p9, 1, 0 }
  0x55   : > { %s2763_s3 = sshll.u32 %s2476_s10, 12  ;;  %s3544_s4 = sld [smem:[#allocation68_spill]] }
  0x56   : > { %3542 = sst [smem:[#allocation45_spill]] %s3541_s7  ;;  %s472_s18 = scalar_lea.vmem [#allocation10], %s2760_s6 }
  0x57   : > { %s479_s19 = sshll.u32 %s472_s18, 4  ;;  %p3545_p6 = scmp.lt.s32.totalorder %s2484_s9, 8  ;;  %s2772_s19 = int_to_ptr.vmem [resolvable:$true] %s479_s19 }
  0x58   : > { %s3548_s14 = sand.u32 1, %s2484_s9  }
  0x59   : > { %p2776_p8 = pnand %p3545_p6, %p181_p4  ;;  %s2782_s20 = scalar_lea.sflag [#allocation11], %s3548_s14 }
  0x5a   : > { %3549 = sst [smem:[#allocation48_spill]] %s2782_s20 }
  0x5b   : > { %s2769_s13 = scalar_lea.hbm %s3544_s4, %s2763_s3  ;;  %p2788_p11 = pneg %p2776_p8 }
  0x5c   : > { %s3546_s0 = scalar_select %p2776_p8, 1, 0 }
  0x5d   : > { %s2080_s8 = scalar_lea.hbm %s2769_s13, 4096  ;;  %s2085_s6 = scalar_lea.hbm %s3544_s4, 8192 }
  0x5e   : > { %3547 = sst [smem:[#allocation47_spill]] %s3546_s0  ;;  %p2081_p10 = scmp.ne.s32.totalorder %s2769_s13, %s2080_s8 }
  0x5f   : > { %p2086_p3 = scmp.lt.u32.totalorder %s2769_s13, %s3544_s4  ;;  %p2087_p13 = scmp.lt.u32.totalorder %s2085_s6, %s2080_s8 }
  0x60   : > { %p2083_p12 = pnand %p2788_p11, %p2081_p10  ;;  %p2089_p6 = scmp.lt.u32.totalorder %s2080_s8, %s2769_s13 }
  0x61   : > { %p2088_p4 = por %p2087_p13, %p2086_p3 }
  0x62   : > { %p2084_p2 = pneg %p2083_p12 }
  0x63   : > { %p2090_p7 = por %p2089_p6, %p2088_p4 }
  0x65   : > { %p2091_p1 = pnand %p2090_p7, %p2084_p2 }
  0x67   : > { %2094 = shalt.err (!%p2091_p1)
}
  0x68   : > { %s2095_s14 = scalar_lea.vmem %s2772_s19, 4096  ;;  %s2489_s7 = smov [#allocation10]  }
  0x69   : > { %p2096_p10 = scmp.ne.s32.totalorder %s2772_s19, %s2095_s14  ;;  %s2100_s18 = sshll.u32 %s2489_s7, 4  ;;  %s2101_s18 = int_to_ptr.vmem [resolvable:$false] %s2100_s18 }
  0x6a   : > { %s2102_s1 = scalar_lea.vmem %s2101_s18, 8192  ;;  %p2103_p9 = scmp.lt.s32.totalorder %s2772_s19, %s2101_s18 }
  0x6b   : > { %p2098_p12 = pnand %p2096_p10, %p2788_p11  ;;  %p2104_p5 = scmp.lt.s32.totalorder %s2102_s1, %s2095_s14 }
  0x6d   : > { %p2099_p0 = pneg %p2098_p12  ;;  %p2105_p3 = por %p2104_p5, %p2103_p9 }
  0x6f   : > { %p2106_p13 = pnand %p2105_p3, %p2099_p0 }
  0x71   : > { %2109 = shalt.err (!%p2106_p13)
}
  0x72   : > { %s3460_s17 = smov 128   ;;  %s3458_s6 = smov 8  }
  0x73   : > { %1847 = dma.hbm_to_vmem [thread:$0]  (!%p2776_p8), %s2769_s13, 4096, %s2772_s19, %s2782_s20, %s3460_s17, %s3460_s17, %s3458_s6  }
  0x74   : > { %s2816_s8 = sadd.s32 4294967295, %s2484_s9   ;;  %s52_s7 = sadd.s32 1, %s2472_s16 }
  0x75   : > { %3551 = sst [smem:[#allocation49_spill]] %s2816_s8  ;;  %p53_p0 = scmp.ge.s32.totalorder %s52_s7, 2 }
  0x76   : > { %s55_s18 = sadd.s32 1, %s2476_s10  ;;  %s59_s1 = sadd.s32 1, %s2480_s11 }
  0x77   : > { %s68_s4 = sadd.s32 1, %s2456_s12  ;;  %s3680_s7 = smov (%p53_p0, %s52_s7), 0 }
  0x78   : > { %3552 = sst [smem:[#allocation50_spill]] %s3680_s7  ;;  %s3682_s18 = smov (!%p53_p0, %s55_s18), %s2476_s10 }
  0x79   : > { %s2828_s19 = ssub.s32 %s2472_s16, %s3680_s7  ;;  %p75_p5 = scmp.ne.s32.totalorder %s2456_s12, %s2452_s30 }
  0x7a   : > { %p57_p7 = scmp.ge.s32.totalorder %s3682_s18, 2  ;;  %p81_p9 = scmp.ne.s32.totalorder %s2452_s30, %s2448_s29 }
  0x7b   : > { %p3553_p1 = scmp.eq.s32.totalorder %s2484_s9, 0  ;;  %p82_p4 = scmp.eq.s32.totalorder %s2816_s8, 0 }
  0x7c   : > { %s3684_s18 = smov (%p57_p7, %s3682_s18), 0  ;;  %s3686_s1 = smov (!%p57_p7, %s59_s1), %s2480_s11 }
  0x7d   : > { %p2836_p2 = por %p3553_p1, %p75_p5  ;;  %3555 = sst [smem:[#allocation51_spill]] %s3684_s18 }
  0x7e   : > { %s3556_s6 = smov %s3684_s18  ;;  %p2844_p6 = por %p82_p4, %p81_p9 }
  0x7f   : > { %p3559_p10 = scmp.ne.s32.totalorder %s2440_s27, %s2436_s26  ;;  %p61_p3 = scmp.ge.s32.totalorder %s3686_s1, 2 }
  0x80   : > { %s3557_s17 = scalar_select %p2844_p6, 1, 0 }
  0x81   : > { %p2851_p12 = por %p3559_p10, %p82_p4  ;;  %s169_s14 = ssub.s32 %s2476_s10, %s3556_s6 }
  0x82   : > { %3558 = sst [smem:[#allocation52_spill]] %s3557_s17  ;;  %s3562_s18 = sld [smem:[#allocation27_spill]] }
  0x83   : > { %s3560_s29 = scalar_select %p2851_p12, 1, 0 }
  0x84   : > { %p170_p13 = scmp.eq.s32.totalorder %s169_s14, 0  ;;  %p3563_p0 = scmp.ne.s32.totalorder %s2428_s24, %s2424_s23 }
  0x85   : > { %3561 = sst [smem:[#allocation53_spill]] %s3560_s29  ;;  %s3688_s1 = smov (%p61_p3, %s3686_s1), 0 }
  0x86   : > { %p2860_p5 = por %p3563_p0, %p82_p4  ;;  %3566 = sst [smem:[#allocation55_spill]] %s3688_s1 }
  0x87   : > { %s3567_s26 = sadd.s32 1, %s2432_s25  ;;  %s63_s27 = ssub.s32 %s2480_s11, %s3688_s1 }
  0x88   : > { %s3564_s7 = scalar_select %p2860_p5, 1, 0 }
  0x89   : > { %s2869_s29 = scalar_select %p170_p13, %s2432_s25, %s3567_s26  }
  0x8a   : > { %3565 = sst [smem:[#allocation54_spill]] %s3564_s7  ;;  %s3569_s17 = sld [smem:[#allocation26_spill]] }
  0x8b   : > { %3568 = sst [smem:[#allocation56_spill]] %s2869_s29  ;;  %s332_s6 = sadd.s32 1, %s2420_s22 }
  0x8c   : > { %s65_s10 = sor.u32 %s2828_s19, %s63_s27  ;;  %p92_p7 = scmp.eq.s32.totalorder %s63_s27, 0 }
  0x8d   : > { %p66_p9 = scmp.eq.s32.totalorder %s65_s10, 0  ;;  %s3570_s23 = sld [smem:[#allocation25_spill]] }
  0x8e   : > { %s329_s24 = sor.u32 %s169_s14, %s65_s10  ;;  %s3571_s30 = sadd.s32 1, %s2444_s28 }
  0x8f   : > { %s3572_s7 = sld [smem:[#allocation24_spill]]  ;;  %p330_p1 = scmp.eq.s32.totalorder %s329_s24, 0 }
  0x90   : > { %s2878_s20 = scalar_select %p92_p7, %s2444_s28, %s3571_s30  }
  0x91   : > { %s2881_s0 = scalar_select %p66_p9, %s2456_s12, %s68_s4  }
  0x92   : > { %3573 = sst [smem:[#allocation57_spill]] %s2878_s20  ;;  %p342_p4 = scmp.ne.s32.totalorder %s2420_s22, %s2416_s21 }
  0x93   : > { %3574 = sst [smem:[#allocation58_spill]] %s2881_s0  ;;  %p343_p10 = scmp.eq.s32.totalorder %s2816_s8, 7 }
  0x94   : > { %p348_p3 = scmp.ne.s32.totalorder %s2416_s21, %s3562_s18  ;;  %s3578_s30 = sadd.s32 4294967294, %s2484_s9  }
  0x95   : > { %s2889_s26 = scalar_select %p330_p1, %s2420_s22, %s332_s6  }
  0x96   : > { %p2893_p13 = por %p343_p10, %p342_p4  ;;  %p349_p0 = scmp.eq.s32.totalorder %s3578_s30, 7 }
  0x97   : > { %3575 = sst [smem:[#allocation59_spill]] %s2889_s26  ;;  %s357_s1 = sor.u32 %s169_s14, %s63_s27 }
  0x98   : > { %s3576_s10 = scalar_select %p2893_p13, 1, 0 }
  0x99   : > { %s362_s4 = sadd.s32 1, %s3569_s17  ;;  %p2900_p7 = por %p349_p0, %p348_p3 }
  0x9a   : > { %3577 = sst [smem:[#allocation60_spill]] %s3576_s10  ;;  %s359_s24 = sor.u32 %s357_s1, %s2828_s19 }
  0x9b   : > { %s3579_s0 = scalar_select %p2900_p7, 1, 0 }
  0x9c   : > { %p360_p9 = scmp.eq.s32.totalorder %s359_s24, 0  ;;  %p372_p1 = scmp.ne.s32.totalorder %s3569_s17, %s3570_s23 }
  0x9d   : > { %3580 = sst [smem:[#allocation61_spill]] %s3579_s0  ;;  %p378_p5 = scmp.ne.s32.totalorder %s3570_s23, %s3572_s7 }
  0x9e   : > { %s399_s6 = sand.u32 1, %s2456_s12   ;;  %s3690_s17 = smov (!%p360_p9, %s3569_s17), %s362_s4 }
  0x9f   : > { %3581 = sst [smem:[#allocation62_spill]] %s3690_s17  ;;  %p2915_p4 = por %p372_p1, %p343_p10 }
  0xa0   : > { %p2919_p13 = por %p378_p5, %p349_p0  ;;  %s1537_s14 = sshll.u32 %s399_s6, 4 }
  0xa1   : > { %s3582_s18 = scalar_select %p2915_p4, 1, 0 }
  0xa2   : > { %s3583_s27 = scalar_select %p2919_p13, 1, 0 }
  0xa3   : > { %s1538_s1 = sshll.u32 %s2472_s16, 1  ;;  %s1539_s19 = sshll.u32 %s2480_s11, 2 }
  0xa4   : > { %3584 = sst [smem:[#allocation63_spill]] %s3583_s27  ;;  %s403_s30 = scalar_lea.vmem [#allocation4], %s1537_s14 }
  0xa5   : > { %s413_s24 = sshll.u32 %s403_s30, 4  ;;  %s409_s20 = sadd.s32 %s1539_s19, %s1538_s1  ;;  %s2925_s24 = int_to_ptr.vmem [resolvable:$true] %s413_s24 }
  0xa6   : > { %s1540_s7 = sshll.u32 %s409_s20, 7  ;;  %p3585_p3 = scmp.lt.s32.totalorder %s2484_s9, 8 }
  0xa7   : > { %s3587_s28 = sld [smem:[#allocation64_spill]]  ;;  %s3589_s30 = sld [smem:[#allocation70_spill]] }
  0xa8   : > { %p2931_p9 = pnand %p3585_p3, %p2836_p2  ;;  %s400_s13 = scalar_lea.sflag [#allocation5], %s399_s6 }
  0xaa   : > { %p2112_p5 = pneg %p2931_p9 }
  0xad   : > { %s3588_s0 = smov %s3587_s28  ;;  %s2938_s29 = scalar_lea.hbm %s3587_s28, %s1540_s7 }
  0xae   : > { %s3590_s8 = smov %s3589_s30  ;;  %s2944_s20 = scalar_lea.hbm %s3589_s30, %s2763_s3 }
  0xaf   : > { %s2110_s1 = scalar_lea.hbm %s2938_s29, 256  ;;  %s2115_s19 = scalar_lea.hbm %s3588_s0, 1024 }
  0xb0   : > { %p2111_p2 = scmp.ne.s32.totalorder %s2938_s29, %s2110_s1  ;;  %p2116_p1 = scmp.lt.u32.totalorder %s2938_s29, %s3588_s0 }
  0xb1   : > { %p2117_p3 = scmp.lt.u32.totalorder %s2115_s19, %s2110_s1  ;;  %p2119_p7 = scmp.lt.u32.totalorder %s2110_s1, %s2938_s29 }
  0xb2   : > { %p2113_p10 = pnand %p2112_p5, %p2111_p2 }
  0xb3   : > { %p2118_p13 = por %p2117_p3, %p2116_p1 }
  0xb4   : > { %p2114_p0 = pneg %p2113_p10 }
  0xb5   : > { %p2120_p4 = por %p2119_p7, %p2118_p13 }
  0xb7   : > { %p2121_p12 = pnand %p2120_p4, %p2114_p0 }
  0xb9   : > { %2124 = shalt.err (!%p2121_p12)
}
  0xba   : > { %s2125_s6 = scalar_lea.vmem %s2925_s24, 256  ;;  %s2492_s4 = smov [#allocation4]  }
  0xbb   : > { %p2126_p2 = scmp.ne.s32.totalorder %s2925_s24, %s2125_s6  ;;  %s2130_s14 = sshll.u32 %s2492_s4, 4  ;;  %s2131_s14 = int_to_ptr.vmem [resolvable:$false] %s2130_s14 }
  0xbc   : > { %s2132_s30 = scalar_lea.vmem %s2131_s14, 512  ;;  %p2133_p8 = scmp.lt.s32.totalorder %s2925_s24, %s2131_s14 }
  0xbd   : > { %p2128_p10 = pnand %p2126_p2, %p2112_p5  ;;  %p2134_p1 = scmp.lt.s32.totalorder %s2132_s30, %s2125_s6 }
  0xbf   : > { %p2129_p6 = pneg %p2128_p10  ;;  %p2135_p3 = por %p2134_p1, %p2133_p8 }
  0xc1   : > { %p2136_p13 = pnand %p2135_p3, %p2129_p6 }
  0xc3   : > { %2139 = shalt.err (!%p2136_p13)
}
  0xc4   : > { %s3591_s1 = sld [smem:[#allocation42_spill]]  ;;  %s2140_s28 = scalar_lea.hbm %s2739_s15, 512 }
  0xc5   : > { %1838 = dma.hbm_to_vmem [thread:$0]  (!%p2931_p9), %s2938_s29, 256, %s2925_s24, %s400_s13  }
  0xc6   : > { %p2141_p12 = scmp.ne.s32.totalorder %s2739_s15, %s2140_s28  ;;  %s2145_s11 = scalar_lea.hbm %s3539_s2, 1024 }
  0xc7   : > { %p2146_p8 = scmp.lt.u32.totalorder %s2739_s15, %s3539_s2  ;;  %p2147_p6 = scmp.lt.u32.totalorder %s2145_s11, %s2140_s28 }
  0xc8   : > { %p2149_p10 = scmp.lt.u32.totalorder %s2140_s28, %s2739_s15 }
  0xc9   : > { %p2148_p2 = por %p2147_p6, %p2146_p8 }
  0xca   : > { %p3592_p7 = scmp.ne.s32.totalorder %s3591_s1, 0 }
  0xcb   : > { %p2150_p1 = por %p2149_p10, %p2148_p2 }
  0xcc   : > { %p3593_p4 = pneg %p3592_p7 }
  0xce   : > { %p2143_p5 = pnand %p2141_p12, %p3593_p4 }
  0xd0   : > { %p2144_p0 = pneg %p2143_p5 }
  0xd2   : > { %p2151_p3 = pnand %p2150_p1, %p2144_p0 }
  0xd4   : > { %2154 = shalt.err (!%p2151_p3)
}
  0xd5   : > { %s3594_s29 = sld [smem:[#allocation44_spill]]  ;;  %p3595_p13 = pmov %p3593_p4 }
  0xd6   : > { %s2493_s13 = smov [#allocation9]  }
  0xd7   : > { %s2160_s6 = sshll.u32 %s2493_s13, 4  ;;  %s2161_s6 = int_to_ptr.vmem [resolvable:$false] %s2160_s6 }
  0xd8   : > { %s2162_s4 = scalar_lea.vmem %s2161_s6, 1024 }
  0xdb   : > { %s2155_s24 = scalar_lea.vmem %s3594_s29, 512  ;;  %p2163_p5 = scmp.lt.s32.totalorder %s3594_s29, %s2161_s6 }
  0xdc   : > { %p2156_p9 = scmp.ne.s32.totalorder %s3594_s29, %s2155_s24  ;;  %p2164_p8 = scmp.lt.s32.totalorder %s2162_s4, %s2155_s24 }
  0xde   : > { %p2158_p12 = pnand %p2156_p9, %p3595_p13  ;;  %p2165_p6 = por %p2164_p8, %p2163_p5 }
  0xe0   : > { %p2159_p4 = pneg %p2158_p12 }
  0xe2   : > { %p2166_p2 = pnand %p2165_p6, %p2159_p4 }
  0xe4   : > { %2169 = shalt.err (!%p2166_p2)
}
  0xe5   : > { %s3596_s14 = smov 16   ;;  %s3597_s30 = smov 256  }
  0xe6   : > { %s3598_s28 = sld [smem:[#allocation43_spill]]  ;;  %s3599_s12 = sld [smem:[#allocation46_spill]] }
  0xe7   : > { %s2170_s7 = scalar_lea.hbm %s2944_s20, 4096  ;;  %s2175_s24 = scalar_lea.hbm %s3590_s8, 8192 }
  0xe8   : > { %p2171_p0 = scmp.ne.s32.totalorder %s2944_s20, %s2170_s7  ;;  %p2176_p3 = scmp.lt.u32.totalorder %s2944_s20, %s3590_s8 }
  0xe9   : > { %p2177_p9 = scmp.lt.u32.totalorder %s2175_s24, %s2170_s7 }
  0xea   : > { %p2173_p10 = pnand %p2171_p0, %p2788_p11 }
  0xeb   : > { %p2178_p13 = por %p2177_p9, %p2176_p3 }
  0xec   : > { %1844 = dma.hbm_to_vmem [thread:$0]  (!%p3592_p7), %s2739_s15, 512, %s3594_s29, %s3598_s28, %s3597_s30, %s3597_s30, %s3596_s14  }
  0xed   : > { %s499_s19 = scalar_lea.vmem [#allocation12], %s3599_s12  ;;  %p2174_p1 = pneg %p2173_p10 }
  0xee   : > { %s506_s11 = sshll.u32 %s499_s19, 4  ;;  %p2179_p7 = scmp.lt.u32.totalorder %s2170_s7, %s2944_s20  ;;  %s2999_s11 = int_to_ptr.vmem [resolvable:$true] %s506_s11 }
  0xf0   : > { %p2180_p12 = por %p2179_p7, %p2178_p13 }
  0xf2   : > { %p2181_p4 = pnand %p2180_p12, %p2174_p1 }
  0xf4   : > { %2184 = shalt.err (!%p2181_p4)
}
  0xf5   : > { %s2185_s15 = scalar_lea.vmem %s2999_s11, 4096  ;;  %s2494_s29 = smov [#allocation12]  }
  0xf6   : > { %p2186_p5 = scmp.ne.s32.totalorder %s2999_s11, %s2185_s15  ;;  %s2190_s4 = sshll.u32 %s2494_s29, 4  ;;  %s2191_s4 = int_to_ptr.vmem [resolvable:$false] %s2190_s4 }
  0xf7   : > { %s2192_s14 = scalar_lea.vmem %s2191_s4, 8192  ;;  %p2193_p2 = scmp.lt.s32.totalorder %s2999_s11, %s2191_s4 }
  0xf8   : > { %p2188_p8 = pnand %p2186_p5, %p2788_p11  ;;  %p2194_p0 = scmp.lt.s32.totalorder %s2192_s14, %s2185_s15 }
  0xfa   : > { %p2189_p6 = pneg %p2188_p8  ;;  %p2195_p10 = por %p2194_p0, %p2193_p2 }
  0xfc   : > { %p2196_p3 = pnand %p2195_p10, %p2189_p6 }
  0xfe   : > { %2199 = shalt.err (!%p2196_p3)
}
  0xff   : > { %s3600_s30 = sld [smem:[#allocation47_spill]]  ;;  %s3602_s28 = smov 8  }
 0x100   : > { %s3603_s19 = smov 128   ;;  %s3604_s7 = sld [smem:[#allocation48_spill]] }
 0x101   : > { %s3605_s24 = sld [smem:[#allocation72_spill]]  ;;  %s526_s15 = scalar_lea.vmem [#allocation13], %s3599_s12 }
 0x102   : > { %s533_s29 = sshll.u32 %s526_s15, 4  ;;  %s3607_s4 = sand.u32 1, %s2432_s25   ;;  %s3033_s29 = int_to_ptr.vmem [resolvable:$true] %s533_s29 }
 0x103   : > { %s3037_s14 = scalar_lea.sflag [#allocation14], %s3607_s4 }
 0x105   : > { %p3601_p1 = scmp.ne.s32.totalorder %s3600_s30, 0 }
 0x107   : > { %1850 = dma.hbm_to_vmem [thread:$0]  (!%p3601_p1), %s2944_s20, 4096, %s2999_s11, %s3604_s7, %s3603_s19, %s3603_s19, %s3602_s28  }
 0x108   : > { %s3606_s6 = smov %s3605_s24  ;;  %s3030_s13 = scalar_lea.hbm %s3605_s24, %s2763_s3 }
 0x109   : > { %s2200_s0 = scalar_lea.hbm %s3030_s13, 4096  ;;  %s2205_s3 = scalar_lea.hbm %s3606_s6, 8192 }
 0x10a   : > { %p2201_p9 = scmp.ne.s32.totalorder %s3030_s13, %s2200_s0  ;;  %p2206_p12 = scmp.lt.u32.totalorder %s3030_s13, %s3606_s6 }
 0x10b   : > { %p2207_p4 = scmp.lt.u32.totalorder %s2205_s3, %s2200_s0  ;;  %p2209_p8 = scmp.lt.u32.totalorder %s2200_s0, %s3030_s13 }
 0x10c   : > { %p2203_p13 = pnand %p2201_p9, %p2788_p11 }
 0x10d   : > { %p2208_p5 = por %p2207_p4, %p2206_p12 }
 0x10e   : > { %p2204_p7 = pneg %p2203_p13 }
 0x10f   : > { %p2210_p6 = por %p2209_p8, %p2208_p5 }
 0x111   : > { %p2211_p2 = pnand %p2210_p6, %p2204_p7 }
 0x113   : > { %2214 = shalt.err (!%p2211_p2)
}
 0x114   : > { %s2215_s12 = scalar_lea.vmem %s3033_s29, 4096  ;;  %s2495_s23 = smov [#allocation13]  }
 0x115   : > { %p2216_p0 = scmp.ne.s32.totalorder %s3033_s29, %s2215_s12  ;;  %s2220_s24 = sshll.u32 %s2495_s23, 4  ;;  %s2221_s24 = int_to_ptr.vmem [resolvable:$false] %s2220_s24 }
 0x116   : > { %s2222_s15 = scalar_lea.vmem %s2221_s24, 8192  ;;  %p2223_p9 = scmp.lt.s32.totalorder %s3033_s29, %s2221_s24 }
 0x117   : > { %p2218_p10 = pnand %p2216_p0, %p2788_p11  ;;  %p2224_p13 = scmp.lt.s32.totalorder %s2222_s15, %s2215_s12 }
 0x119   : > { %p2219_p3 = pneg %p2218_p10  ;;  %p2225_p12 = por %p2224_p13, %p2223_p9 }
 0x11b   : > { %p2226_p4 = pnand %p2225_p12, %p2219_p3 }
 0x11d   : > { %2229 = shalt.err (!%p2226_p4)
}
 0x11e   : > { %1853 = dma.hbm_to_vmem [thread:$0]  (!%p3601_p1), %s3030_s13, 4096, %s3033_s29, %s3037_s14, %s3603_s19, %s3603_s19, %s3602_s28  }
 0x11f   : > { %s3608_s0 = sld [smem:[#allocation45_spill]] }
 0x125   : > { %p3609_p11 = scmp.ne.s32.totalorder %s3608_s0, 0 }
 0x126   : > { %s3610_s5 = sld [smem:[#allocation33_spill]] (!%p3609_p11)  ;;  %s3611_s4 = sld [smem:[#allocation52_spill]] (!%p3609_p11) }
 0x127   : > { %551 = sbr.rel (%p3609_p11) target bundleno = 1604 (0x644), region = 60 }
 0x12c   : > { %s553_s20 = sand.u32 (!%p3609_p11), 1, %s3610_s5   ;;  %p3612_p7 = scmp.ne.s32.totalorder (!%p3609_p11), %s3611_s4, 0 }
 0x12d   : > { %s3067_s11 = sshll.u32 (!%p3609_p11), %s553_s20, 4  ;;  %s554_s3 = scalar_lea.sflag (!%p3609_p11), [#allocation5], %s553_s20 }
 0x12e   : > { %2375 = dma.done.wait (%p3612_p7), %s554_s3, 256  }
 0x12f   : > { %2377 = vsyncadd (%p3612_p7), %s554_s3, 4294967040  ;;  %s3613_s30 = sld [smem:[#allocation49_spill]]  ;;  %s3614_s1 = sld [smem:[#allocation31_spill]] }
 0x130   : > { %s3615_s12 = sld [smem:[#allocation53_spill]] }
 0x135   : > { %s562_s28 = sand.u32 1, %s3613_s30   ;;  %s564_s19 = sand.u32 1, %s3614_s1  }
 0x136   : > { %s1558_s13 = sshll.u32 %s564_s19, 5  ;;  %s563_s29 = scalar_lea.sflag [#allocation8], %s562_s28 }
 0x137   : > { %s3076_s14 = scalar_lea.vmem [#allocation7], %s1558_s13  ;;  %p3616_p1 = scmp.ne.s32.totalorder %s3615_s12, 0 }
 0x139   : > { %2379 = dma.done.wait (%p3616_p1), %s563_s29, 1024  }
 0x13a   : > { %2381 = vsyncadd (%p3616_p1), %s563_s29, 4294966272  ;;  %s3617_s23 = sld [smem:[#allocation29_spill]]  ;;  %s3618_s24 = sld [smem:[#allocation54_spill]] }
 0x13b   : > { %s3083_s5 = scalar_lea.vmem [#allocation9], %s1558_s13  ;;  %s581_s4 = scalar_lea.sflag [#allocation11], %s562_s28 }
 0x140   : > { %s582_s15 = sand.u32 1, %s3617_s23   ;;  %p3619_p5 = scmp.ne.s32.totalorder %s3618_s24, 0 }
 0x141   : > { %s1560_s0 = sshll.u32 %s582_s15, 8 }
 0x142   : > { %s3085_s20 = scalar_lea.vmem [#allocation10], %s1560_s0 }
 0x143   : > { %2383 = dma.done.wait (%p3619_p5), %s581_s4, 8192  }
 0x144   : > { %2385 = vsyncadd (%p3619_p5), %s581_s4, 4294959104  ;;  %s3091_s3 = scalar_lea.vmem [#allocation12], %s1560_s0  ;;  %s599_s30 = scalar_lea.sflag [#allocation14], %s582_s15 }
 0x145   : > { %s3093_s1 = scalar_lea.vmem [#allocation13], %s1560_s0 }
 0x146   : > { %2387 = dma.done.wait (%p3619_p5), %s599_s30, 4096  }
 0x147   : > { %2389 = vsyncadd (%p3619_p5), %s599_s30, 4294963200  ;;  %s3620_s12 = sld [smem:[#allocation25_spill]]  ;;  %s3622_s19 = sld [smem:[#allocation36_spill]] }
 0x148   : > { %s3621_s28 = sld [smem:[#allocation37_spill]]  ;;  %s3491_s13 = sand.u32 1, %s2416_s21  }
 0x149   : > { %s3103_s23 = sshll.u32 %s3491_s13, 3  ;;  %s3623_s4 = sld [smem:[#allocation67_spill]] }
 0x14a   : > { %s3624_s7 = sld [smem:[#allocation69_spill]]  ;;  %s3625_s8 = sld [smem:[#allocation71_spill]] }
 0x14b   : > { %s3626_s22 = sld [smem:[#allocation73_spill]]  ;;  %s675_s27 = scalar_lea.vmem [#allocation15], %s3103_s23 }
 0x14c   : > { %s3627_s10 = sld [smem:[#allocation35_spill]] }
 0x14d   : > { %s3492_s29 = sand.u32 1, %s3620_s12   ;;  %p686_p6 = scmp.lt.s32.totalorder %s3622_s19, 1 }
 0x14e   : > { %s3107_s15 = sshll.u32 %s3492_s29, 3  ;;  %p683_p8 = scmp.lt.s32.totalorder %s3621_s28, 1 }
 0x14f   : > { %s3694_s19 = smov (!%p686_p6, %s3622_s19), 1  ;;  %s682_s9 = scalar_lea.vmem [#allocation16], %s3107_s15 }
 0x150   : > { %s3692_s28 = smov (!%p683_p8, %s3621_s28), 1  ;;  %s688_s29 = scalar_lea.vmem %s3624_s7, %s3694_s19 }
 0x151   : > { %s685_s30 = scalar_lea.vmem %s3623_s4, %s3692_s28  ;;  %s691_s16 = scalar_lea.vmem %s3625_s8, %s3694_s19 }
 0x152   : > { %s694_s17 = scalar_lea.vmem %s3626_s22, %s3694_s19  ;;  %p1565_p2 = scmp.ne.s32.totalorder %s3627_s10, 0 }
 0x153   : > { %v719_v0 = vld [vmem:[%s3091_s3 + $0x80] sm:$0xff] (!%p1565_p2)  ;;  %v720_v1 = vld [vmem:[%s3091_s3 + $0x88] sm:$0xff] (!%p1565_p2)  ;;  %v721_v11 = vld [vmem:[%s3091_s3 + $0x90] sm:$0xff] (!%p1565_p2) }
 0x154   : > { %698 = sbr.rel (%p1565_p2) target bundleno = 598 (0x256), region = 88  ;;  %v837_v2 = vld [vmem:[%s3093_s1 + $0x80] sm:$0xff] (!%p1565_p2)  ;;  %v1717_v3 = vpack.c.bf16 (!%p1565_p2), %v720_v1, %v719_v0  ;;  %v838_v4 = vld [vmem:[%s3093_s1 + $0x88] sm:$0xff] (!%p1565_p2)  ;;  %v722_v13 = vld [vmem:[%s3091_s3 + $0x98] sm:$0xff] (!%p1565_p2) }
 0x155   : > { %v703_v5 = vld [vmem:[%s3091_s3] sm:$0xff] (!%p1565_p2)  ;;  %v704_v6 = vld [vmem:[%s3091_s3 + $0x8] sm:$0xff] (!%p1565_p2)  ;;  %v1749_v7 = vpack.c.bf16 (!%p1565_p2), %v838_v4, %v837_v2  ;;  %v839_v14 = vld [vmem:[%s3093_s1 + $0x90] sm:$0xff] (!%p1565_p2)  ;;  %v1721_v16 = vpack.c.bf16 (!%p1565_p2), %v722_v13, %v721_v11 }
 0x156   : > { %v1719_v8 = vpack.c.bf16 (!%p1565_p2), %v704_v6, %v703_v5  ;;  %v821_v9 = vld [vmem:[%s3093_s1] sm:$0xff] (!%p1565_p2)  ;;  %v822_v10 = vld [vmem:[%s3093_s1 + $0x8] sm:$0xff] (!%p1565_p2)  ;;  %1718 = vmatprep.subr.bf16.mxu0 (!%p1565_p2), %v1717_v3  ;;  %v840_v15 = vld [vmem:[%s3093_s1 + $0x98] sm:$0xff] (!%p1565_p2) }
 0x157   : > { %v1751_v12 = vpack.c.bf16 (!%p1565_p2), %v822_v10, %v821_v9  ;;  %1750 = vmatprep.subr.bf16.mxu1 (!%p1565_p2), %v1749_v7  ;;  %v1753_v17 = vpack.c.bf16 (!%p1565_p2), %v840_v15, %v839_v14  ;;  %v705_v18 = vld [vmem:[%s3091_s3 + $0x10] sm:$0xff] (!%p1565_p2)  ;;  %v706_v19 = vld [vmem:[%s3091_s3 + $0x18] sm:$0xff] (!%p1565_p2)  ;;  %v723_v23 = vld [vmem:[%s3091_s3 + $0xa0] sm:$0xff] (!%p1565_p2) }
 0x158   : > { %1720 = vmatpush3.bf16.msra.mxu0 (!%p1565_p2), %v1719_v8  ;;  %v823_v20 = vld [vmem:[%s3093_s1 + $0x10] sm:$0xff] (!%p1565_p2)  ;;  %v1723_v21 = vpack.c.bf16 (!%p1565_p2), %v706_v19, %v705_v18  ;;  %v824_v22 = vld [vmem:[%s3093_s1 + $0x18] sm:$0xff] (!%p1565_p2)  ;;  %v724_v24 = vld [vmem:[%s3091_s3 + $0xa8] sm:$0xff] (!%p1565_p2) }
 0x159   : > { %1752 = vmatpush3.bf16.msra.mxu1 (!%p1565_p2), %v1751_v12  ;;  %1722 = vmatprep.subr.bf16.mxu0 (!%p1565_p2), %v1721_v16  ;;  %v1755_v25 = vpack.c.bf16 (!%p1565_p2), %v824_v22, %v823_v20  ;;  %v1725_v26 = vpack.c.bf16 (!%p1565_p2), %v724_v24, %v723_v23  ;;  %v841_v27 = vld [vmem:[%s3093_s1 + $0xa0] sm:$0xff] (!%p1565_p2)  ;;  %v842_v28 = vld [vmem:[%s3093_s1 + $0xa8] sm:$0xff] (!%p1565_p2)  ;;  %v725_v35 = vld [vmem:[%s3091_s3 + $0xb0] sm:$0xff] (!%p1565_p2) }
 0x15a   : > { %1754 = vmatprep.subr.bf16.mxu1 (!%p1565_p2), %v1753_v17  ;;  %v707_v29 = vld [vmem:[%s3091_s3 + $0x20] sm:$0xff] (!%p1565_p2)  ;;  %v1757_v30 = vpack.c.bf16 (!%p1565_p2), %v842_v28, %v841_v27  ;;  %v708_v31 = vld [vmem:[%s3091_s3 + $0x28] sm:$0xff] (!%p1565_p2)  ;;  %v726_v36 = vld [vmem:[%s3091_s3 + $0xb8] sm:$0xff] (!%p1565_p2) }
 0x15b   : > { %v825_v32 = vld [vmem:[%s3093_s1 + $0x20] sm:$0xff]  ;;  %v826_v33 = vld [vmem:[%s3093_s1 + $0x28] sm:$0xff]  ;;  %v1727_v34 = vpack.c.bf16 %v708_v31, %v707_v29  ;;  %v843_v37 = vld [vmem:[%s3093_s1 + $0xb0] sm:$0xff]  ;;  %v1729_v39 = vpack.c.bf16 %v726_v36, %v725_v35 }
 0x15c   : > { %1724 = vmatpush3.bf16.msra.mxu0 %v1723_v21  ;;  %v1759_v38 = vpack.c.bf16 %v826_v33, %v825_v32  ;;  %v844_v40 = vld [vmem:[%s3093_s1 + $0xb8] sm:$0xff]  ;;  %v709_v41 = vld [vmem:[%s3091_s3 + $0x30] sm:$0xff]  ;;  %v727_v46 = vld [vmem:[%s3091_s3 + $0xc0] sm:$0xff] }
 0x15d   : > { %1756 = vmatpush3.bf16.msra.mxu1 %v1755_v25  ;;  %1726 = vmatprep.subr.bf16.mxu0 %v1725_v26  ;;  %v710_v42 = vld [vmem:[%s3091_s3 + $0x38] sm:$0xff]  ;;  %v1761_v43 = vpack.c.bf16 %v844_v40, %v843_v37  ;;  %v827_v44 = vld [vmem:[%s3093_s1 + $0x30] sm:$0xff]  ;;  %v728_v47 = vld [vmem:[%s3091_s3 + $0xc8] sm:$0xff] }
 0x15e   : > { %1758 = vmatprep.subr.bf16.mxu1 %v1757_v30  ;;  %v828_v45 = vld [vmem:[%s3093_s1 + $0x38] sm:$0xff]  ;;  %v845_v48 = vld [vmem:[%s3093_s1 + $0xc0] sm:$0xff]  ;;  %v846_v49 = vld [vmem:[%s3093_s1 + $0xc8] sm:$0xff]  ;;  %v1731_v50 = vpack.c.bf16 %v710_v42, %v709_v41  ;;  %v1733_v52 = vpack.c.bf16 %v728_v47, %v727_v46 }
 0x15f   : > { %v1763_v51 = vpack.c.bf16 %v828_v45, %v827_v44  ;;  %v711_v53 = vld [vmem:[%s3091_s3 + $0x40] sm:$0xff]  ;;  %v712_v54 = vld [vmem:[%s3091_s3 + $0x48] sm:$0xff]  ;;  %v1765_v56 = vpack.c.bf16 %v846_v49, %v845_v48  ;;  %v729_v58 = vld [vmem:[%s3091_s3 + $0xd0] sm:$0xff] }
 0x160   : > { %1728 = vmatpush3.bf16.msra.mxu0 %v1727_v34  ;;  %v829_v55 = vld [vmem:[%s3093_s1 + $0x40] sm:$0xff]  ;;  %v830_v57 = vld [vmem:[%s3093_s1 + $0x48] sm:$0xff]  ;;  %v730_v59 = vld [vmem:[%s3091_s3 + $0xd8] sm:$0xff]  ;;  %v1735_v62 = vpack.c.bf16 %v712_v54, %v711_v53 }
 0x161   : > { %1760 = vmatpush3.bf16.msra.mxu1 %v1759_v38  ;;  %1730 = vmatprep.subr.bf16.mxu0 %v1729_v39  ;;  %v847_v60 = vld [vmem:[%s3093_s1 + $0xd0] sm:$0xff]  ;;  %v848_v61 = vld [vmem:[%s3093_s1 + $0xd8] sm:$0xff]  ;;  %v1767_v63 = vpack.c.bf16 %v830_v57, %v829_v55  ;;  %v1737_v0 = vpack.c.bf16 %v730_v59, %v729_v58  ;;  %v731_v6 = vld [vmem:[%s3091_s3 + $0xe0] sm:$0xff] }
 0x162   : > { %1762 = vmatprep.subr.bf16.mxu1 %v1761_v43  ;;  %v713_v1 = vld [vmem:[%s3091_s3 + $0x50] sm:$0xff]  ;;  %v714_v2 = vld [vmem:[%s3091_s3 + $0x58] sm:$0xff]  ;;  %v1769_v4 = vpack.c.bf16 %v848_v61, %v847_v60  ;;  %v732_v7 = vld [vmem:[%s3091_s3 + $0xe8] sm:$0xff] }
 0x163   : > { %v831_v3 = vld [vmem:[%s3093_s1 + $0x50] sm:$0xff]  ;;  %v832_v5 = vld [vmem:[%s3093_s1 + $0x58] sm:$0xff]  ;;  %v849_v8 = vld [vmem:[%s3093_s1 + $0xe0] sm:$0xff]  ;;  %v1739_v10 = vpack.c.bf16 %v714_v2, %v713_v1  ;;  %v1741_v14 = vpack.c.bf16 %v732_v7, %v731_v6 }
 0x164   : > { %1732 = vmatpush3.bf16.msra.mxu0 %v1731_v50  ;;  %v850_v9 = vld [vmem:[%s3093_s1 + $0xe8] sm:$0xff]  ;;  %v715_v11 = vld [vmem:[%s3091_s3 + $0x60] sm:$0xff]  ;;  %v1771_v13 = vpack.c.bf16 %v832_v5, %v831_v3  ;;  %v733_v20 = vld [vmem:[%s3091_s3 + $0xf0] sm:$0xff] }
 0x165   : > { %1764 = vmatpush3.bf16.msra.mxu1 %v1763_v51  ;;  %1734 = vmatprep.subr.bf16.mxu0 %v1733_v52  ;;  %v716_v12 = vld [vmem:[%s3091_s3 + $0x68] sm:$0xff]  ;;  %v833_v15 = vld [vmem:[%s3093_s1 + $0x60] sm:$0xff]  ;;  %v1773_v18 = vpack.c.bf16 %v850_v9, %v849_v8  ;;  %v734_v21 = vld [vmem:[%s3091_s3 + $0xf8] sm:$0xff] }
 0x166   : > { %1766 = vmatprep.subr.bf16.mxu1 %v1765_v56  ;;  %v700_v16 = vld [vmem:[%s3076_s14 + $0x8] sm:$0xff]  ;;  %v851_v22 = vld [vmem:[%s3093_s1 + $0xf0] sm:$0xff]  ;;  %v852_v23 = vld [vmem:[%s3093_s1 + $0xf8] sm:$0xff]  ;;  %v1743_v24 = vpack.c.bf16 %v716_v12, %v715_v11  ;;  %v1745_v26 = vpack.c.bf16 %v734_v21, %v733_v20 }
 0x167   : > { %v818_v17 = vld [vmem:[%s3083_s5 + $0x8] sm:$0xff]  ;;  %806 = vmatprep.mubr.f32.mxu0 %v700_v16  ;;  %v717_v27 = vld [vmem:[%s3091_s3 + $0x70] sm:$0xff]  ;;  %v718_v28 = vld [vmem:[%s3091_s3 + $0x78] sm:$0xff]  ;;  %v1777_v29 = vpack.c.bf16 %v852_v23, %v851_v22 }
 0x168   : > { %1736 = vmatpush3.bf16.msra.mxu0 %v1735_v62  ;;  %v834_v19 = vld [vmem:[%s3093_s1 + $0x68] sm:$0xff]  ;;  %924 = vmatprep.mubr.f32.mxu1 %v818_v17  ;;  %v835_v30 = vld [vmem:[%s3093_s1 + $0x70] sm:$0xff]  ;;  %v836_v31 = vld [vmem:[%s3093_s1 + $0x78] sm:$0xff]  ;;  %v1747_v32 = vpack.c.bf16 %v718_v28, %v717_v27 }
 0x169   : > { %1768 = vmatpush3.bf16.msra.mxu1 %v1767_v63  ;;  %1738 = vmatprep.subr.bf16.mxu0 %v1737_v0  ;;  %v1775_v25 = vpack.c.bf16 %v834_v19, %v833_v15  ;;  %v1779_v33 = vpack.c.bf16 %v836_v31, %v835_v30  ;;  %v699_v34 = vld [vmem:[%s3076_s14] sm:$0xff]  ;;  %v702_v36 = vld [vmem:[%s3076_s14 + $0x18] sm:$0xff]  ;;  %v701_v38 = vld [vmem:[%s3076_s14 + $0x10] sm:$0xff] }
 0x16a   : > { %1770 = vmatprep.subr.bf16.mxu1 %v1769_v4  ;;  %v817_v35 = vld [vmem:[%s3083_s5] sm:$0xff]  ;;  %v820_v37 = vld [vmem:[%s3083_s5 + $0x18] sm:$0xff]  ;;  %v819_v39 = vld [vmem:[%s3083_s5 + $0x10] sm:$0xff] }
 0x16b   : > { %v1566_v42 = vld [vmem:[%s691_s16] ss:$0 sm:$0xff] }
 0x16c   : > { %1740 = vmatpush3.bf16.msra.mxu0 %v1739_v10  ;;  %v1567_v45 = vld [vmem:[%s694_s17] ss:$0 sm:$0xff] }
 0x16d   : > { %1772 = vmatpush3.bf16.msra.mxu1 %v1771_v13  ;;  %1742 = vmatprep.subr.bf16.mxu0 %v1741_v14 }
 0x16e   : > { %1774 = vmatprep.subr.bf16.mxu1 %v1773_v18 }
 0x170   : > { %1744 = vmatpush3.bf16.msra.mxu0 %v1743_v24 }
 0x171   : > { %1776 = vmatpush3.bf16.msra.mxu1 %v1775_v25  ;;  %1746 = vmatprep.subr.bf16.mxu0 %v1745_v26 }
 0x172   : > { %1778 = vmatprep.subr.bf16.mxu1 %v1777_v29 }
 0x174   : > { %1748 = vmatpush3.bf16.msra.mxu0 %v1747_v32 }
 0x175   : > { %1780 = vmatpush3.bf16.msra.mxu1 %v1779_v33 }
 0x177   : > { %807 = vmatmul.mubr.f32.vlgmr.msra.gmra.mrb[0].mxu0 %v699_v34 }
 0x178   : > { %925 = vmatmul.mubr.f32.vlgmr.msra.gmra.mrb[0].mxu1 %v817_v35  ;;  %811 = vmatprep.mubr.f32.mxu0 %v702_v36 }
 0x179   : > { %929 = vmatprep.mubr.f32.mxu1 %v820_v37 }
 0x17b   : > { %812 = vmatmul.mubr.f32.gmra.mrb[2].mxu0 %v701_v38 }
 0x17c   : > { %930 = vmatmul.mubr.f32.gmra.mrb[2].mxu1 %v819_v39 }
 0x24a   : > { %v1618_v40 = vpop.f32.mrb[0].mxu0 }
 0x24b   : > { %v1656_v41 = vpop.f32.mrb[0].mxu1  ;;  %v1619_v43 = vpop.f32.mrb[1].mxu0 }
 0x24c   : > { %v1620_v44 = vadd.f32 %v1619_v43, %v1618_v40  ;;  %v1657_v46 = vpop.f32.mrb[1].mxu1 }
 0x24d   : > { %v1658_v47 = vadd.f32 %v1657_v46, %v1656_v41 }
 0x24e   : > { %v809_v48 = vadd.f32 %v1620_v44, %v1566_v42  ;;  %v1621_v49 = vpop.f32.mrb[2].mxu0 }
 0x24f   : > { %v927_v50 = vadd.f32 %v1658_v47, %v1567_v45  ;;  %v1659_v51 = vpop.f32.mrb[2].mxu1  ;;  %v1622_v52 = vpop.f32.mrb[3].mxu0 }
 0x250   : > { %935 = vst [vmem:[#allocation2] sm:$0xff] %v809_v48  ;;  %v1623_v53 = vadd.f32 %v1622_v52, %v1621_v49  ;;  %v1660_v54 = vpop.f32.mrb[3].mxu1 }
 0x251   : > { %937 = vst [vmem:[#allocation3] sm:$0xff] %v927_v50  ;;  %v1661_v55 = vadd.f32 %v1660_v54, %v1659_v51 }
 0x252   : > { %v814_v56 = vadd.f32 %v1623_v53, %v1566_v42 }
 0x253   : > { %v932_v57 = vadd.f32 %v1661_v55, %v1567_v45 }
 0x254   : > { %936 = vst [vmem:[#allocation2 + $0x8] sm:$0xff] %v814_v56 }
 0x255   : > { %938 = vst [vmem:[#allocation3 + $0x8] sm:$0xff] %v932_v57 }
 0x256 PF: > { %v957_v58 = vld [vmem:[%s3085_s20 + $0x80] sm:$0xff]  ;;  %v958_v59 = vld [vmem:[%s3085_s20 + $0x88] sm:$0xff]  ;;  %v959_v63 = vld [vmem:[%s3085_s20 + $0x90] sm:$0xff]  ;;  %v2496_v1 = vmov 0.0|0.0   ;;  %s3630_s16 = scalar_lea.vmem [#allocation4], %s3067_s11  ;;  %vm2497_vm0 = vmmov 0  }
 0x257   : > { %v941_v60 = vld [vmem:[%s3085_s20] sm:$0xff]  ;;  %v1781_v61 = vpack.c.bf16 %v958_v59, %v957_v58  ;;  %v942_v62 = vld [vmem:[%s3085_s20 + $0x8] sm:$0xff]  ;;  %v960_v0 = vld [vmem:[%s3085_s20 + $0x98] sm:$0xff]  ;;  %1813 = vmatprep.subr.bf16.mxu1 %v2496_v1  ;;  %s3631_s17 = smov %s3630_s16  ;;  %v2498_v48 = vmov 0.0   ;;  %vm1129_vm1 = vcmask 130048   ;;  %s3634_s11 = sld [smem:[#allocation36_spill]] }
 0x258   : > { %v1783_v2 = vpack.c.bf16 %v942_v62, %v941_v60  ;;  %v1785_v3 = vpack.c.bf16 %v960_v0, %v959_v63  ;;  %v943_v4 = vld [vmem:[%s3085_s20 + $0x10] sm:$0xff]  ;;  %v944_v5 = vld [vmem:[%s3085_s20 + $0x18] sm:$0xff]  ;;  %v961_v6 = vld [vmem:[%s3085_s20 + $0xa0] sm:$0xff]  ;;  %1707 = vmatprep.mubr.msk.f32.mxu1 %vm2497_vm0, %v2498_v48  ;;  %s3635_s1 = sld [smem:[#allocation37_spill]]  ;;  %s3636_s19 = sld [smem:[#allocation35_spill]] }
 0x259   : > { %1782 = vmatprep.subr.bf16.mxu0 %v1781_v61  ;;  %v962_v7 = vld [vmem:[%s3085_s20 + $0xa8] sm:$0xff]  ;;  %v1787_v8 = vpack.c.bf16 %v944_v5, %v943_v4  ;;  %v945_v10 = vld [vmem:[%s3085_s20 + $0x20] sm:$0xff]  ;;  %v963_v12 = vld [vmem:[%s3085_s20 + $0xb0] sm:$0xff]  ;;  %s3637_s28 = sld [smem:[#allocation25_spill]]  ;;  %s1258_s4 = sshll.u32 %s682_s9, 4  ;;  %s3277_s4 = int_to_ptr.vmem [resolvable:$true] %s1258_s4 }
 0x25a   : > { %1784 = vmatpush3.bf16.msra.mxu0 %v1783_v2  ;;  %v1789_v9 = vpack.c.bf16 %v962_v7, %v961_v6  ;;  %v946_v11 = vld [vmem:[%s3085_s20 + $0x28] sm:$0xff]  ;;  %v964_v13 = vld [vmem:[%s3085_s20 + $0xb8] sm:$0xff]  ;;  %v947_v16 = vld [vmem:[%s3085_s20 + $0x30] sm:$0xff]  ;;  %s3638_s22 = sld [smem:[#allocation75_spill]]  ;;  %p3641_p10 = scmp.ne.s32.totalorder %s3582_s18, 0 }
 0x25b   : > { %1786 = vmatprep.subr.bf16.mxu0 %v1785_v3  ;;  %v1791_v14 = vpack.c.bf16 %v946_v11, %v945_v10  ;;  %v1793_v15 = vpack.c.bf16 %v964_v13, %v963_v12  ;;  %v948_v17 = vld [vmem:[%s3085_s20 + $0x38] sm:$0xff]  ;;  %v965_v18 = vld [vmem:[%s3085_s20 + $0xc0] sm:$0xff]  ;;  %v966_v19 = vld [vmem:[%s3085_s20 + $0xc8] sm:$0xff] }
 0x25c   : > { %v940_v20 = vld [vmem:[%s3630_s16 + $0x8] sm:$0xff]  ;;  %v1050_v21 = vld [vmem:[#allocation2] sm:$0xff]  ;;  %v1795_v23 = vpack.c.bf16 %v948_v17, %v947_v16  ;;  %v1797_v25 = vpack.c.bf16 %v966_v19, %v965_v18  ;;  %v967_v28 = vld [vmem:[%s3085_s20 + $0xd0] sm:$0xff]  ;;  %s2230_s16 = scalar_lea.vmem %s3277_s4, 128 }
 0x25d   : > { %1044 = vmatprep.mubr.f32.mxu0 %v940_v20  ;;  %v1051_v22 = vld [vmem:[#allocation2 + $0x8] sm:$0xff]  ;;  %v949_v26 = vld [vmem:[%s3085_s20 + $0x40] sm:$0xff]  ;;  %v968_v29 = vld [vmem:[%s3085_s20 + $0xd8] sm:$0xff]  ;;  %s1576_s13 = sshll.u32 %s3634_s11, 1  ;;  %p2231_p0 = scmp.ne.s32.totalorder %s3277_s4, %s2230_s16 }
 0x25e   : > { %1788 = vmatpush3.bf16.msra.mxu0 %v1787_v8  ;;  %v1814_v24 = vpack.c.bf16 %v1051_v22, %v1050_v21  ;;  %v950_v27 = vld [vmem:[%s3085_s20 + $0x48] sm:$0xff]  ;;  %v1801_v31 = vpack.c.bf16 %v968_v29, %v967_v28  ;;  %v951_v32 = vld [vmem:[%s3085_s20 + $0x50] sm:$0xff]  ;;  %v952_v33 = vld [vmem:[%s3085_s20 + $0x58] sm:$0xff]  ;;  %s1252_s24 = sadd.s32 %s3636_s19, %s1576_s13 }
 0x25f   : > { %1790 = vmatprep.subr.bf16.mxu0 %v1789_v9  ;;  %v1799_v30 = vpack.c.bf16 %v950_v27, %v949_v26  ;;  %v969_v34 = vld [vmem:[%s3085_s20 + $0xe0] sm:$0xff]  ;;  %v970_v35 = vld [vmem:[%s3085_s20 + $0xe8] sm:$0xff]  ;;  %v1803_v36 = vpack.c.bf16 %v952_v33, %v951_v32  ;;  %v971_v40 = vld [vmem:[%s3085_s20 + $0xf0] sm:$0xff]  ;;  %s3640_s26 = sand.u32 1, %s3637_s28   ;;  %p2232_p3 = pnand %p2231_p0, %p3641_p10 }
 0x260   : > { %1815 = vmatpush3.bf16.xpose.msra.mxu1 %v1814_v24  ;;  %v1805_v37 = vpack.c.bf16 %v970_v35, %v969_v34  ;;  %v953_v38 = vld [vmem:[%s3085_s20 + $0x60] sm:$0xff]  ;;  %v954_v39 = vld [vmem:[%s3085_s20 + $0x68] sm:$0xff]  ;;  %v972_v41 = vld [vmem:[%s3085_s20 + $0xf8] sm:$0xff]  ;;  %s3639_s8 = smov %s3638_s22  ;;  %s1224_s10 = scalar_lea.sflag [#allocation17], %s3640_s26 }
 0x261   : > { %1816 = vmatprep.subr.bf16.mxu1 %v2496_v1  ;;  %v1807_v42 = vpack.c.bf16 %v954_v39, %v953_v38  ;;  %v1809_v43 = vpack.c.bf16 %v972_v41, %v971_v40  ;;  %v955_v44 = vld [vmem:[%s3085_s20 + $0x70] sm:$0xff]  ;;  %v956_v45 = vld [vmem:[%s3085_s20 + $0x78] sm:$0xff]  ;;  %v939_v47 = vld [vmem:[%s3631_s17] sm:$0xff]  ;;  %p2233_p9 = pneg %p2232_p3  ;;  %s2499_s17 = smov [#allocation16]  }
 0x262   : > { %1792 = vmatpush3.bf16.msra.mxu0 %v1791_v14  ;;  %v1811_v46 = vpack.c.bf16 %v956_v45, %v955_v44  ;;  %v1568_v50 = vld [vmem:[%s688_s29] ss:$0 sm:$0xff]  ;;  %v1142_v0 = vld [vmem:[#allocation3] sm:$0xff]  ;;  %v1143_v1 = vld [vmem:[#allocation3 + $0x8] sm:$0xff]  ;;  %s1574_s29 = sshll.u32 %s3635_s1, 2  ;;  %s2234_s15 = sshll.u32 %s2499_s17, 4  ;;  %s2235_s15 = int_to_ptr.vmem [resolvable:$false] %s2234_s15 }
 0x263   : > { %1794 = vmatprep.subr.bf16.mxu0 %v1793_v15  ;;  %v1569_v54 = vld [vmem:[%s685_s30] ss:$0 sm:$0xff]  ;;  %v1817_v2 = vpack.c.bf16 %v1143_v1, %v1142_v0  ;;  %s1254_s0 = sadd.s32 %s1574_s29, %s1252_s24  ;;  %p2237_p13 = scmp.lt.s32.totalorder %s3277_s4, %s2235_s15 }
 0x264   : > { %s1578_s30 = sshll.u32 %s1254_s0, 7 }
 0x265   : > { %s1256_s25 = scalar_lea.hbm %s3638_s22, %s1578_s30 }
 0x266   : > { %1796 = vmatpush3.bf16.msra.mxu0 %v1795_v23 }
 0x267   : > { %1798 = vmatprep.subr.bf16.mxu0 %v1797_v25 }
 0x26a   : > { %1800 = vmatpush3.bf16.msra.mxu0 %v1799_v30 }
 0x26b   : > { %1802 = vmatprep.subr.bf16.mxu0 %v1801_v31 }
 0x26e   : > { %1804 = vmatpush3.bf16.msra.mxu0 %v1803_v36 }
 0x26f   : > { %1806 = vmatprep.subr.bf16.mxu0 %v1805_v37 }
 0x272   : > { %1808 = vmatpush3.bf16.msra.mxu0 %v1807_v42 }
 0x273   : > { %1810 = vmatprep.subr.bf16.mxu0 %v1809_v43 }
 0x276   : > { %1812 = vmatpush3.bf16.msra.mxu0 %v1811_v46 }
 0x279   : > { %1045 = vmatmul.mubr.f32.vlgmr.msra.gmra.mrb[0].mxu0 %v939_v47 }
 0x34c   : > { %v1694_v49 = vpop.f32.mrb[0].mxu0 }
 0x34d   : > { %v1695_v51 = vpop.f32.mrb[1].mxu0 }
 0x34e   : > { %v1696_v52 = vadd.f32 %v1695_v51, %v1694_v49 }
 0x350   : > { %v1047_v53 = vadd.f32 %v1696_v52, %v1568_v50 }
 0x352   : > { %1708 = vmatmul.mubr.f32.vlgmr.msra.gmra.mrb[0].mxu1 %v1047_v53 }
 0x353   : > { %1714 = vmatprep.mubr.msk.f32.mxu1 %vm2497_vm0, %v2498_v48  ;;  %1818 = vmatpush3.bf16.msra.mxu1 %v1817_v2 }
 0x425   : > { %v1125_v55 = vpop.f32.mrb[0].mxu1 }
 0x426   : > { %v1126_v56 = vadd.f32 %v1569_v54, %v1125_v55  ;;  %v1709_v57 = vpop.f32.mrb[1].mxu1 }
 0x428   : > { %v1130_v58 = vsel %vm1129_vm1, %v1126_v56, -inf }
 0x429   : > { %1131 = vmax.xlane.f32.xlu0 %v1130_v58 }
 0x4b6   : > { %v1132_v59 = vpop.xlane.xlu0 %1131 }
 0x4b7   : > { %v1133_v60 = vsub.f32 %v1126_v56, %v1132_v59 }
 0x4b9   : > { %v1134_v61 = vmul.f32 1.442695, %v1133_v60 }
 0x4bb   : > { %2046 = vpow2.f32 %v1134_v61 }
 0x4c5   : > { %v2047_v62 = vpop.eup %2046 }
 0x4c6   : > { %v1136_v63 = vsel %vm1129_vm1, %v2047_v62, 0.0 }
 0x4c7   : > { %1137 = vadd.xlane.f32.xlu0 %v1136_v63 }
 0x554   : > { %v1138_v3 = vpop.xlane.xlu0 %1137 }
 0x555   : > { %2048 = vrcp.f32 %v1138_v3 }
 0x55f   : > { %v2049_v4 = vpop.eup %2048 }
 0x560   : > { %v1140_v5 = vmul.f32 %v2049_v4, %v2047_v62 }
 0x562   : > { %1141 = vst.msk [vmem:[%s682_s9] sm:$0xff] %vm1129_vm1, %v1140_v5  ;;  %1715 = vmatmul.mubr.msk.f32.vlgmr.msra.gmra.mrb[2].mxu1 %vm1129_vm1, %v1140_v5  ;;  %s2236_s9 = scalar_lea.vmem %s2235_s15, 256 }
 0x563   : > { %p2238_p12 = scmp.lt.s32.totalorder %s2236_s9, %s2230_s16 }
 0x565   : > { %p2239_p4 = por %p2238_p12, %p2237_p13 }
 0x567   : > { %p2240_p11 = pnand %p2239_p4, %p2233_p9 }
 0x569   : > { %2243 = shalt.err (!%p2240_p11)
}
 0x56a   : > { %s2244_s6 = scalar_lea.hbm %s1256_s25, 128  ;;  %s2248_s5 = scalar_lea.hbm %s3639_s8, 1024 }
 0x56b   : > { %p2245_p7 = scmp.ne.s32.totalorder %s1256_s25, %s2244_s6  ;;  %p2249_p8 = scmp.lt.u32.totalorder %s1256_s25, %s3639_s8 }
 0x56c   : > { %p2250_p6 = scmp.lt.u32.totalorder %s2248_s5, %s2244_s6  ;;  %p2252_p0 = scmp.lt.u32.totalorder %s2244_s6, %s1256_s25 }
 0x56d   : > { %p2246_p1 = pnand %p2245_p7, %p3641_p10 }
 0x56e   : > { %p2251_p2 = por %p2250_p6, %p2249_p8 }
 0x56f   : > { %p2247_p5 = pneg %p2246_p1 }
 0x570   : > { %p2253_p3 = por %p2252_p0, %p2251_p2 }
 0x572   : > { %p2254_p9 = pnand %p2253_p3, %p2247_p5 }
 0x574   : > { %2257 = shalt.err (!%p2254_p9)
}
 0x575   : > { %s3642_s28 = sld [smem:[#allocation60_spill]]  ;;  %s1573_s13 = sshll.u32 %s3636_s19, 1 }
 0x576   : > { %1832 = dma.vmem_to_hbm [thread:$0]  (%p3641_p10), %s3277_s4, 128, %s1256_s25, %s1224_s10  }
 0x577   : > { %s1235_s24 = sadd.s32 %s3634_s11, %s1573_s13  ;;  %s1241_s12 = sshll.u32 %s675_s27, 4  ;;  %s3311_s12 = int_to_ptr.vmem [resolvable:$true] %s1241_s12 }
 0x578   : > { %s1237_s0 = sadd.s32 %s1574_s29, %s1235_s24  ;;  %s3643_s26 = sld [smem:[#allocation74_spill]] }
 0x579   : > { %s1575_s30 = sshll.u32 %s1237_s0, 7  ;;  %s3645_s11 = sand.u32 1, %s2416_s21  }
 0x57a   : > { %s1219_s1 = scalar_lea.sflag [#allocation6], %s3645_s11  ;;  %s2258_s19 = scalar_lea.vmem %s3311_s12, 128 }
 0x57b   : > { %p2259_p10 = scmp.ne.s32.totalorder %s3311_s12, %s2258_s19  ;;  %p3646_p13 = scmp.ne.s32.totalorder %s3642_s28, 0 }
 0x57c   : > { %s2500_s29 = smov [#allocation15]  }
 0x57d   : > { %p2260_p12 = pnand %p2259_p10, %p3646_p13  ;;  %s2262_s4 = sshll.u32 %s2500_s29, 4  ;;  %s2263_s4 = int_to_ptr.vmem [resolvable:$false] %s2262_s4 }
 0x57e   : > { %s3644_s6 = smov %s3643_s26  ;;  %s3309_s18 = scalar_lea.hbm %s3643_s26, %s1575_s30 }
 0x57f   : > { %p2261_p4 = pneg %p2260_p12  ;;  %s2264_s25 = scalar_lea.vmem %s2263_s4, 256 }
 0x580   : > { %p2265_p11 = scmp.lt.s32.totalorder %s3311_s12, %s2263_s4  ;;  %p2266_p7 = scmp.lt.s32.totalorder %s2264_s25, %s2258_s19 }
 0x582   : > { %p2267_p1 = por %p2266_p7, %p2265_p11 }
 0x584   : > { %p2268_p5 = pnand %p2267_p1, %p2261_p4 }
 0x635   : > { %v1213_v6 = vpop.f32.mrb[2].mxu1 }
 0x636   : > { %1217 = vst [vmem:[%s675_s27] sm:$0xff] %v1213_v6  ;;  %v1716_v7 = vpop.f32.mrb[3].mxu1 }
 0x637   : > { %2271 = shalt.err (!%p2268_p5)
}
 0x638   : > { %s2272_s27 = scalar_lea.hbm %s3309_s18, 128  ;;  %s2276_s16 = scalar_lea.hbm %s3644_s6, 1024 }
 0x639   : > { %p2273_p8 = scmp.ne.s32.totalorder %s3309_s18, %s2272_s27  ;;  %p2277_p0 = scmp.lt.u32.totalorder %s3309_s18, %s3644_s6 }
 0x63a   : > { %p2278_p3 = scmp.lt.u32.totalorder %s2276_s16, %s2272_s27  ;;  %p2280_p10 = scmp.lt.u32.totalorder %s2272_s27, %s3309_s18 }
 0x63b   : > { %p2274_p6 = pnand %p2273_p8, %p3646_p13 }
 0x63c   : > { %p2279_p9 = por %p2278_p3, %p2277_p0 }
 0x63d   : > { %p2275_p2 = pneg %p2274_p6 }
 0x63e   : > { %p2281_p12 = por %p2280_p10, %p2279_p9 }
 0x640   : > { %p2282_p4 = pnand %p2281_p12, %p2275_p2 }
 0x642   : > { %2285 = shalt.err (!%p2282_p4)
}
 0x643   : > { %1831 = dma.vmem_to_hbm [thread:$0]  (%p3646_p13), %s3311_s12, 128, %s3309_s18, %s1219_s1  }
 0x644 PF: > { %s3647_s9 = sld [smem:[#allocation41_spill]]  ;;  %s3648_s7 = sld [smem:[#allocation27_spill]] }
 0x645   : > { %s3649_s14 = sld [smem:[#allocation61_spill]] }
 0x64a   : > { %p1862_p11 = scmp.ge.s32.totalorder %s3647_s9, 2  ;;  %s1270_s5 = sand.u32 1, %s3648_s7  }
 0x64b   : > { %p3650_p7 = scmp.ne.s32.totalorder %s3649_s14, 0  ;;  %s1271_s20 = scalar_lea.sflag [#allocation6], %s1270_s5 }
 0x64d   : > { %p1855_p1 = pnand %p1862_p11, %p3650_p7 }
 0x64f   : > { %2391 = dma.done.wait (!%p1855_p1), %s1271_s20, 128  }
 0x650   : > { %2393 = vsyncadd (!%p1855_p1), %s1271_s20, 4294967168  ;;  %s3651_s3 = sld [smem:[#allocation24_spill]]  ;;  %s3652_s13 = sld [smem:[#allocation63_spill]] }
 0x656   : > { %s1279_s24 = sand.u32 1, %s3651_s3   ;;  %p3653_p5 = scmp.ne.s32.totalorder %s3652_s13, 0 }
 0x657   : > { %s1280_s28 = scalar_lea.sflag [#allocation17], %s1279_s24 }
 0x658   : > { %p1858_p8 = pnand %p1862_p11, %p3653_p5 }
 0x65a   : > { %2395 = dma.done.wait (!%p1858_p8), %s1280_s28, 128  }
 0x65b   : > { %2397 = vsyncadd (!%p1858_p8), %s1280_s28, 4294967168  ;;  %s40_s9 = sadd.s32 1, %s3647_s9   ;;  %s3655_s17 = sld [smem:[#allocation25_spill]] }
 0x65c   : > { %p3346_p13 = scmp.ge.s32.totalorder %s40_s9, 10   ;;  %s3656_s18 = sld [smem:[#allocation26_spill]] }
 0x65d   : > { %s3657_s19 = sld [smem:[#allocation62_spill]]  ;;  %s3658_s30 = sld [smem:[#allocation28_spill]] }
 0x65e   : > { %s3659_s22 = sld [smem:[#allocation59_spill]]  ;;  %s3660_s23 = sld [smem:[#allocation29_spill]] }
 0x65f   : > { %s3661_s24 = sld [smem:[#allocation30_spill]]  ;;  %s3662_s25 = sld [smem:[#allocation56_spill]] }
 0x660   : > { %s3663_s26 = sld [smem:[#allocation31_spill]]  ;;  %s3664_s27 = sld [smem:[#allocation32_spill]] }
 0x661   : > { %s3665_s28 = sld [smem:[#allocation57_spill]]  ;;  %s3666_s29 = sld [smem:[#allocation33_spill]] }
 0x662   : > { %s3667_s12 = sld [smem:[#allocation34_spill]]  ;;  %s3668_s2 = sld [smem:[#allocation58_spill]] }
 0x663   : > { %s3669_s13 = sld [smem:[#allocation38_spill]]  ;;  %s3670_s14 = sld [smem:[#allocation39_spill]] }
 0x664   : > { %s3671_s15 = sld [smem:[#allocation40_spill]]  ;;  %s3672_s16 = sld [smem:[#allocation50_spill]] }
 0x665   : > { %s3673_s20 = smov %s2416_s21  ;;  %s3674_s10 = sld [smem:[#allocation51_spill]] }
 0x666   : > { %s3675_s21 = smov %s3658_s30  ;;  %s3676_s11 = sld [smem:[#allocation55_spill]] }
 0x667   :  { %39 = sbr.rel (!%p3346_p13) target bundleno = 35 (0x23), region = 199 }
 0x668   : > { %s3677_s30 = smov %s3667_s12  ;;  %s3678_s12 = smov %s3668_s2 }
 0x66e   :  { %1285 = vsyncpa [#allocation5], 1 }
 0x66f   :  { %1287 = vsyncpa [#allocation5 + $0x1], 1 }
 0x670   :  { %1288 = vsyncpa [#allocation8], 1 }
 0x671   :  { %1290 = vsyncpa [#allocation8 + $0x1], 1 }
 0x672   :  { %1291 = vsyncpa [#allocation11], 1 }
 0x673   :  { %1293 = vsyncpa [#allocation11 + $0x1], 1 }
 0x674   :  { %1294 = vsyncpa [#allocation14], 1 }
 0x675   :  { %1296 = vsyncpa [#allocation14 + $0x1], 1 }
 0x676   :  { %1297 = vsyncpa [#allocation6], 1 }
 0x677   :  { %1299 = vsyncpa [#allocation6 + $0x1], 1 }
 0x678   :  { %1300 = vsyncpa [#allocation17], 1 }
 0x679   :  { %1302 = vsyncpa [#allocation17 + $0x1], 1 }

</bundles_post_ra>
